<compile_context>
chip_gen: v5e
topology: v5e:2x2
jax: 0.10.0
libtpu: 0.0.40
codegen_flags: <defaults>
</compile_context>

<pallas_src>
import functools
import numpy as np
import jax
import jax.numpy as jnp
from jax.experimental import pallas as pl
from jax.experimental.pallas import tpu as pltpu

LN_EPS = 1e-5


def _vmem_limit_bytes():
    """Generation-aware VMEM budget (v5e/v6e: 128 MiB phys -> ~77 MiB; v7x: 64 MiB -> ~38 MiB)."""
    try:
        info = pltpu.get_tpu_info()
        cap = getattr(info, "vmem_capacity_bytes", None)
        if cap:
            return int(min(cap * 0.6, 96 * 1024 * 1024))
    except Exception:
        pass
    return 48 * 1024 * 1024


VMEM_LIMIT = _vmem_limit_bytes()


# ---------------------------- tiling helpers ----------------------------

def _pick_row_tile(M, cap=512):
    """Largest row tile <= cap that divides M (prefers multiples of 8; never one giant block)."""
    cap = max(8, int(cap))
    if M <= cap:
        return M
    best = 1
    for d in range(cap, 0, -1):
        if M % d == 0:
            if d % 8 == 0:
                return d
            if best == 1:
                best = d
    # TODO(synk): pad M to a tile multiple with a masked tail instead of tiny divisors.
    return best


def _attn_rows_target(C, vmem_limit):
    """Rows (windows*N) per attention grid step, bounded by the VMEM budget."""
    budget = vmem_limit // 2                      # headroom for double-buffering / temporaries
    fixed = 16 * C * C + 2 * 1024 * 1024          # qkv+proj weights (bf16, 2 bufs) + slack
    per_row = 40 * C                              # in/out blocks + f32/bf16 qkv + scratch
    if budget <= fixed + 256 * per_row:
        return 256
    return int(min(4096, (budget - fixed) // per_row))


def _pick_rh(nwr, nwc, N, B, rows_target):
    """Window-rows per attention grid step (divides nwr); keeps >=4 grid steps when possible."""
    tw = max(1, min(64, rows_target // max(N, 1)))     # windows/step target (trace-size capped)
    rt = max(1, tw // max(nwc, 1))
    divs = [d for d in range(1, nwr + 1) if nwr % d == 0]
    rh = max([d for d in divs if d <= rt] or [1])
    while rh > 1 and B * (nwr // rh) < 4:              # pipelining + v7x 2-TC sharding
        smaller = [d for d in divs if d < rh]
        if not smaller:
            break
        rh = smaller[-1]
    return rh


def _mlp_row_cap(C, Ch, vmem_limit):
    budget = vmem_limit // 2
    weights = 4 * (C * Ch + Ch * C)                    # bf16 fc1+fc2, double-buffered
    per_row = 4 * (3 * C + 2 * Ch)
    if budget <= weights + 64 * per_row:
        return 64
    return int(min(512, (budget - weights) // per_row))


# ---------------------------- Pallas kernels ----------------------------

def _ln_kernel(x_ref, g_ref, b_ref, o_ref, *, eps):
    x = x_ref[...].astype(jnp.float32)
    mu = jnp.mean(x, axis=-1, keepdims=True)
    var = jnp.mean((x - mu) ** 2, axis=-1, keepdims=True)
    y = (x - mu) * jax.lax.rsqrt(var + eps)
    o_ref[...] = (y * g_ref[...] + b_ref[...]).astype(o_ref.dtype)


def ln_pl(x2d, g, b, eps=LN_EPS):
    # stand-alone LayerNorm (only used on the padded-resolution fallback path)
    M, C = x2d.shape
    tm = _pick_row_tile(M, cap=1024)
    return pl.pallas_call(
        functools.partial(_ln_kernel, eps=eps),
        out_shape=jax.ShapeDtypeStruct((M, C), x2d.dtype),
        grid=(M // tm,),
        in_specs=[
            pl.BlockSpec((tm, C), lambda i: (i, 0)),
            pl.BlockSpec((1, C), lambda i: (0, 0)),
            pl.BlockSpec((1, C), lambda i: (0, 0)),
        ],
        out_specs=pl.BlockSpec((tm, C), lambda i: (i, 0)),
        compiler_params=pltpu.CompilerParams(dimension_semantics=("parallel",)),
    )(x2d, g, b)


def _attn_kernel(*refs, num_heads, eps, use_mask, fuse_ln, ws, rh, nwc):
    it = iter(refs)
    x_ref = next(it)
    if fuse_ln:
        g_ref = next(it)
        bta_ref = next(it)
    qkvw_ref = next(it)
    qkvb_ref = next(it)
    bias_ref = next(it)
    mask_ref = next(it) if use_mask else None
    projw_ref = next(it)
    projb_ref = next(it)
    o_ref = next(it)

    C = x_ref.shape[-1]
    hd = C // num_heads
    N = ws * ws
    W_ = rh * nwc
    R = W_ * N

    x = x_ref[...].astype(jnp.float32)                      # (1, rh*ws, Wp, C)
    if fuse_ln:                                             # fused norm1 (commutes with roll/partition)
        mu = jnp.mean(x, axis=-1, keepdims=True)
        var = jnp.mean((x - mu) ** 2, axis=-1, keepdims=True)
        x = (x - mu) * jax.lax.rsqrt(var + eps) * g_ref[...] + bta_ref[...]

    # ---- window partition in VMEM (replaces one XLA HBM transpose pass) ----
    parts = [x[0, i * ws:(i + 1) * ws, j * ws:(j + 1) * ws, :].reshape(1, N, C)
             for i in range(rh) for j in range(nwc)]
    xw = jnp.concatenate(parts, axis=0)                     # (W_, N, C), window-major
    xf = xw.reshape(R, C).astype(jnp.bfloat16)

    # qkv: softmax scale pre-folded into the q third of the weights/bias on the host
    qkv = jnp.dot(xf, qkvw_ref[...], preferred_element_type=jnp.float32) + qkvb_ref[...]
    qkv = qkv.astype(jnp.bfloat16)                          # single cast; halves live qkv slab

    bias = bias_ref[...]                                    # (heads, N, N) f32
    mask = mask_ref[...] if use_mask else None              # (W_, N, N) f32

    head_outs = []
    for h in range(num_heads):                              # static unroll; windows batched per head
        q = qkv[:, h * hd:(h + 1) * hd].reshape(W_, N, hd)
        k = qkv[:, C + h * hd:C + (h + 1) * hd].reshape(W_, N, hd)
        v = qkv[:, 2 * C + h * hd:2 * C + (h + 1) * hd].reshape(W_, N, hd)
        s = jnp.einsum('wnd,wmd->wnm', q, k, preferred_element_type=jnp.float32)
        s = s + bias[h]
        if use_mask:
            s = s + mask
        m = jnp.max(s, axis=-1, keepdims=True)
        e = jnp.exp(s - m)
        inv = pl.reciprocal(jnp.sum(e, axis=-1, keepdims=True), approx=False)
        prob = (e * inv).astype(jnp.bfloat16)
        head_outs.append(jnp.einsum('wnm,wmd->wnd', prob, v,
                                    preferred_element_type=jnp.float32).astype(jnp.bfloat16))

    # single full-width output projection (K = C -> full MXU contraction fill, no f32 acc churn)
    o_cat = jnp.concatenate(head_outs, axis=-1).reshape(R, C)
    out = jnp.dot(o_cat, projw_ref[...], preferred_element_type=jnp.float32) + projb_ref[...]

    # ---- window reverse in VMEM (replaces the other XLA HBM transpose pass) ----
    rows = []
    for i in range(rh):
        row = [out[(i * nwc + j) * N:(i * nwc + j + 1) * N, :].reshape(ws, ws, C)
               for j in range(nwc)]
        rows.append(jnp.stack(row, axis=1).reshape(ws, nwc * ws, C))   # (ws, Wp, C)
    o_full = jnp.concatenate(rows, axis=0)                  # (rh*ws, Wp, C)
    o_ref[...] = jnp.expand_dims(o_full, 0).astype(o_ref.dtype)


def attn_pl(xn, mask, p, num_heads, fuse_ln, ws):
    """Fused norm1 + window partition + W-MSA + window reverse.
    xn: (B, Hp, Wp, C) f32 -> (B, Hp, Wp, C) bf16."""
    B, Hp, Wp, C = xn.shape
    nwr, nwc = Hp // ws, Wp // ws
    N = ws * ws
    use_mask = mask is not None
    rh = _pick_rh(nwr, nwc, N, B, _attn_rows_target(C, VMEM_LIMIT))
    grid = (B, nwr // rh)

    kernel = functools.partial(_attn_kernel, num_heads=num_heads, eps=LN_EPS,
                               use_mask=use_mask, fuse_ln=fuse_ln, ws=ws, rh=rh, nwc=nwc)

    in_specs = [pl.BlockSpec((1, rh * ws, Wp, C), lambda b, r: (b, r, 0, 0))]
    args = [xn]
    if fuse_ln:
        in_specs += [pl.BlockSpec((1, C), lambda b, r: (0, 0)),
                     pl.BlockSpec((1, C), lambda b, r: (0, 0))]
        args += [p['norm1_g'], p['norm1_b']]
    # TODO(synk): pipeline_mode=pl.Buffered(1) on these grid-invariant weight specs would halve
    # their VMEM footprint on v7x; kept at default double-buffering for lowering safety.
    in_specs += [pl.BlockSpec((C, 3 * C), lambda b, r: (0, 0)),
                 pl.BlockSpec((1, 3 * C), lambda b, r: (0, 0)),
                 pl.BlockSpec((num_heads, N, N), lambda b, r: (0, 0, 0))]
    args += [p['qkv_w'], p['qkv_b'], p['rel_bias']]
    if use_mask:
        in_specs += [pl.BlockSpec((rh * nwc, N, N), lambda b, r: (r, 0, 0))]
        args += [mask]                                      # (nW, N, N): no B-fold duplication
    in_specs += [pl.BlockSpec((C, C), lambda b, r: (0, 0)),
                 pl.BlockSpec((1, C), lambda b, r: (0, 0))]
    args += [p['proj_w'], p['proj_b']]

    return pl.pallas_call(
        kernel,
        out_shape=jax.ShapeDtypeStruct((B, Hp, Wp, C), jnp.bfloat16),   # bf16 inter-kernel stream
        grid=grid,
        in_specs=in_specs,
        out_specs=pl.BlockSpec((1, rh * ws, Wp, C), lambda b, r: (b, r, 0, 0)),
        compiler_params=pltpu.CompilerParams(
            dimension_semantics=("parallel", "parallel"),
            vmem_limit_bytes=VMEM_LIMIT),
    )(*args)


def _mlp_kernel(s_ref, a_ref, g_ref, b_ref, w1_ref, b1_ref, w2_ref, b2_ref, o_ref, *, eps):
    # fused: x = shortcut + attn_out ; out = x + fc2(gelu(fc1(layernorm(x))))
    x = s_ref[...].astype(jnp.float32) + a_ref[...].astype(jnp.float32)
    mu = jnp.mean(x, axis=-1, keepdims=True)
    var = jnp.mean((x - mu) ** 2, axis=-1, keepdims=True)
    y = (x - mu) * jax.lax.rsqrt(var + eps) * g_ref[...] + b_ref[...]
    h = jnp.dot(y.astype(jnp.bfloat16), w1_ref[...],
                preferred_element_type=jnp.float32) + b1_ref[...]
    h = jax.nn.gelu(h, approximate=False)     # exact erf, matching nn.GELU default
    y2 = jnp.dot(h.astype(jnp.bfloat16), w2_ref[...],
                 preferred_element_type=jnp.float32) + b2_ref[...]
    o_ref[...] = (x + y2).astype(o_ref.dtype)


def mlp_pl(shortcut2d, attn2d, p):
    M, C = shortcut2d.shape
    Ch = p['fc1_w'].shape[1]
    tm = _pick_row_tile(M, cap=_mlp_row_cap(C, Ch, VMEM_LIMIT))
    # TODO(synk): for very large C on v7x, add a hidden-dim grid axis ("arbitrary") with an
    # f32 accumulator instead of shrinking the row tile.
    return pl.pallas_call(
        functools.partial(_mlp_kernel, eps=LN_EPS),
        out_shape=jax.ShapeDtypeStruct((M, C), shortcut2d.dtype),
        grid=(M // tm,),
        in_specs=[
            pl.BlockSpec((tm, C), lambda i: (i, 0)),
            pl.BlockSpec((tm, C), lambda i: (i, 0)),
            pl.BlockSpec((1, C), lambda i: (0, 0)),
            pl.BlockSpec((1, C), lambda i: (0, 0)),
            pl.BlockSpec((C, Ch), lambda i: (0, 0)),
            pl.BlockSpec((1, Ch), lambda i: (0, 0)),
            pl.BlockSpec((Ch, C), lambda i: (0, 0)),
            pl.BlockSpec((1, C), lambda i: (0, 0)),
        ],
        out_specs=pl.BlockSpec((tm, C), lambda i: (i, 0)),
        compiler_params=pltpu.CompilerParams(
            dimension_semantics=("parallel",),
            vmem_limit_bytes=VMEM_LIMIT),
    )(shortcut2d, attn2d, p['norm2_g'], p['norm2_b'],
      p['fc1_w'], p['fc1_b'], p['fc2_w'], p['fc2_b'])


def _expand_kernel(x_ref, w_ref, g_ref, b_ref, o_ref, *, eps, co):
    # weight columns pre-permuted so output columns are [subpixel k][channel c]
    x = x_ref[...].astype(jnp.bfloat16)
    y = jnp.dot(x, w_ref[...], preferred_element_type=jnp.float32)    # (tm, 4*co)
    g = g_ref[...]
    b = b_ref[...]
    parts = []
    for k in range(4):                                                # per sub-pixel LN
        yk = y[:, k * co:(k + 1) * co]
        mu = jnp.mean(yk, axis=-1, keepdims=True)
        var = jnp.mean((yk - mu) ** 2, axis=-1, keepdims=True)
        parts.append((yk - mu) * jax.lax.rsqrt(var + eps) * g + b)
    # single lane-dense store instead of four masked partial stores
    o_ref[...] = jnp.concatenate(parts, axis=-1).astype(o_ref.dtype)


def expand_pl(x2d, p):
    M, C = x2d.shape
    C2 = p['expand_w'].shape[1]
    co = C2 // 4
    tm = _pick_row_tile(M, cap=512)
    return pl.pallas_call(
        functools.partial(_expand_kernel, eps=LN_EPS, co=co),
        out_shape=jax.ShapeDtypeStruct((M, C2), x2d.dtype),
        grid=(M // tm,),
        in_specs=[
            pl.BlockSpec((tm, C), lambda i: (i, 0)),
            pl.BlockSpec((C, C2), lambda i: (0, 0)),
            pl.BlockSpec((1, co), lambda i: (0, 0)),
            pl.BlockSpec((1, co), lambda i: (0, 0)),
        ],
        out_specs=pl.BlockSpec((tm, C2), lambda i: (i, 0)),
        compiler_params=pltpu.CompilerParams(
            dimension_semantics=("parallel",),
            vmem_limit_bytes=VMEM_LIMIT),
    )(x2d, p['expand_w'], p['norm_g'], p['norm_b'])


# ---------------------------- pure-JAX reference (for checking) ----------------------------

def ln_ref(x2d, g, b, eps=LN_EPS):
    mu = jnp.mean(x2d, -1, keepdims=True)
    var = jnp.mean((x2d - mu) ** 2, -1, keepdims=True)
    return (x2d - mu) / jnp.sqrt(var + eps) * g + b


def attn_ref(x_windows, mask, p, num_heads, nW):
    NW, N, C = x_windows.shape
    hd = C // num_heads
    scale = hd ** -0.5
    qkv = x_windows @ p['qkv_w'] + p['qkv_b'][0]
    qkv = qkv.reshape(NW, N, 3, num_heads, hd).transpose(2, 0, 3, 1, 4)
    q, k, v = qkv[0] * scale, qkv[1], qkv[2]
    attn = jnp.einsum('whnd,whmd->whnm', q, k)
    attn = attn + p['rel_bias'][None]
    if mask is not None:
        attn = attn.reshape(NW // nW, nW, num_heads, N, N) + mask[None, :, None]
        attn = attn.reshape(NW, num_heads, N, N)
    attn = jax.nn.softmax(attn, axis=-1)
    out = jnp.einsum('whnm,whmd->whnd', attn, v)
    out = out.transpose(0, 2, 1, 3).reshape(NW, N, C)
    return out @ p['proj_w'] + p['proj_b'][0]


def mlp_ref(shortcut2d, attn2d, p):
    x = shortcut2d + attn2d
    y = ln_ref(x, p['norm2_g'], p['norm2_b'])
    h = jax.nn.gelu(y @ p['fc1_w'] + p['fc1_b'][0], approximate=False)
    return x + (h @ p['fc2_w'] + p['fc2_b'][0])


def expand_ref(x2d, p):
    C2 = p['expand_w'].shape[1]
    co = C2 // 4
    y = x2d @ p['expand_w']                                   # columns ordered c*4 + k
    y = y.reshape(-1, co, 4).transpose(0, 2, 1)               # (M, 4, co)
    mu = jnp.mean(y, -1, keepdims=True)
    var = jnp.mean((y - mu) ** 2, -1, keepdims=True)
    y = (y - mu) * jax.lax.rsqrt(var + LN_EPS) * p['norm_g'] + p['norm_b']
    return y.reshape(-1, C2)


# ---------------------------- glue (shifts / masks / spatial rearrange) ----------------------------

def window_partition(x, ws):
    B, H, W, C = x.shape
    x = x.reshape(B, H // ws, ws, W // ws, ws, C)
    return x.transpose(0, 1, 3, 2, 4, 5).reshape(-1, ws, ws, C)


def window_reverse(windows, ws, H, W):
    B = windows.shape[0] // (H * W // (ws * ws))
    x = windows.reshape(B, H // ws, W // ws, ws, ws, -1)
    return x.transpose(0, 1, 3, 2, 4, 5).reshape(B, H, W, -1)


def create_mask_np(H, W, ws, ss):
    Hp = int(np.ceil(H / ws)) * ws
    Wp = int(np.ceil(W / ws)) * ws
    img_mask = np.zeros((1, Hp, Wp, 1), np.float32)
    slices = (slice(0, -ws), slice(-ws, -ss), slice(-ss, None))
    cnt = 0
    for h in slices:
        for w in slices:
            img_mask[:, h, w, :] = cnt
            cnt += 1
    mw = img_mask.reshape(1, Hp // ws, ws, Wp // ws, ws, 1)
    mw = mw.transpose(0, 1, 3, 2, 4, 5).reshape(-1, ws * ws)
    attn_mask = mw[:, None, :] - mw[:, :, None]
    attn_mask = np.where(attn_mask != 0, -100.0, 0.0).astype(np.float32)
    return attn_mask  # (nW, N, N)


def rel_position_index(ws):
    # double_step_seq(2*Ww-1, Wh, 1, Ww) + transpose + flip(1), as in the module
    seq1 = np.arange(0, (2 * ws - 1) * ws, 2 * ws - 1)
    seq2 = np.arange(0, ws, 1)
    coords = (seq1[:, None] + seq2[None, :]).reshape(1, -1)   # (1, N)
    idx = coords + coords.T                                   # (N, N)
    idx = np.ascontiguousarray(idx[:, ::-1])
    return idx


def swin_block_pl(x, H, W, p, ws, shift, num_heads, attn_mask_np):
    B, L, C = x.shape
    assert L == H * W
    shortcut = x
    pad_r = (ws - W % ws) % ws
    pad_b = (ws - H % ws) % ws
    if pad_r or pad_b:
        # fallback: LN outside the kernel, then zero-pad (matches PyTorch order)
        xn = ln_pl(x.reshape(B * L, C), p['norm1_g'], p['norm1_b']).reshape(B, H, W, C)
        xn = jnp.pad(xn, ((0, 0), (0, pad_b), (0, pad_r), (0, 0)))
        fuse_ln = False
    else:
        xn = x.reshape(B, H, W, C)
        fuse_ln = True                        # norm1 fused inside the attention kernel
    Hp, Wp = H + pad_b, W + pad_r
    if shift > 0:
        xn = jnp.roll(xn, (-shift, -shift), axis=(1, 2))
        mask = jnp.asarray(attn_mask_np)      # (nW, N, N)
    else:
        mask = None
    # fused norm1 + window partition + W-MSA + window reverse (bf16 output stream)
    attn4d = attn_pl(xn, mask, p, num_heads, fuse_ln, ws)      # (B, Hp, Wp, C) bf16
    if shift > 0:
        attn4d = jnp.roll(attn4d, (shift, shift), axis=(1, 2))
    if pad_r or pad_b:
        attn4d = attn4d[:, :H, :W, :]
    # residual add + norm2 + MLP + residual fused in one kernel (f32 block carry)
    return mlp_pl(shortcut.reshape(B * L, C), attn4d.reshape(B * L, C), p).reshape(B, L, C)


def swin_block_ref(x, H, W, p, ws, shift, num_heads, attn_mask_np):
    B, L, C = x.shape
    shortcut = x
    xn = ln_ref(x.reshape(B * L, C), p['norm1_g'], p['norm1_b']).reshape(B, H, W, C)
    pad_r = (ws - W % ws) % ws
    pad_b = (ws - H % ws) % ws
    xn = jnp.pad(xn, ((0, 0), (0, pad_b), (0, pad_r), (0, 0)))
    Hp, Wp = H + pad_b, W + pad_r
    if shift > 0:
        xn = jnp.roll(xn, (-shift, -shift), axis=(1, 2))
        mask = jnp.asarray(attn_mask_np)
    else:
        mask = None
    nW = (Hp // ws) * (Wp // ws)
    N = ws * ws
    x_windows = window_partition(xn, ws).reshape(-1, N, C)
    attn_windows = attn_ref(x_windows, mask, p, num_heads, nW)
    xr = window_reverse(attn_windows.reshape(-1, ws, ws, C), ws, Hp, Wp)
    if shift > 0:
        xr = jnp.roll(xr, (shift, shift), axis=(1, 2))
    if pad_r or pad_b:
        xr = xr[:, :H, :W, :]
    return mlp_ref(shortcut.reshape(B * L, C), xr.reshape(B * L, C), p).reshape(B, L, C)


def patch_expand(x, H, W, p, *, expand_fn):
    B, L, C = x.shape
    y = expand_fn(x.reshape(B * L, C), p)              # (B*L, 2C), sub-pixel(k)-major, LN'd
    co = y.shape[-1] // 4
    # PixelShuffle spatial rearrangement (single cheap transpose in XLA)
    y = y.reshape(B, H, W, 2, 2, co).transpose(0, 1, 3, 2, 4, 5).reshape(B, 4 * H * W, co)
    return y, 2 * H, 2 * W


def basic_layer_up(x, H, W, params, *, depth, num_heads, window_size,
                   x_downsample=None, block_fn, expand_fn):
    ws = window_size
    ss = ws // 2
    attn_mask_np = create_mask_np(H, W, ws, ss) if depth > 1 else None
    for i in range(depth):
        shift = 0 if i % 2 == 0 else ss
        x = block_fn(x, H, W, params['blocks'][i], ws, shift, num_heads, attn_mask_np)
    if x_downsample is not None:
        x = jnp.concatenate([x, x_downsample], axis=-1)
    x, H, W = patch_expand(x, H, W, params['upsample'], expand_fn=expand_fn)
    return x, H, W


# ---------------------------- parameters ----------------------------

def init_params(key, dim, depth, num_heads, ws, mlp_ratio=4.0):
    N = ws * ws
    hidden = int(dim * mlp_ratio)
    tbl = (2 * ws - 1) * (2 * ws - 1)
    keys = iter(jax.random.split(key, 64))

    def nrm(shape, std=0.02):
        return (std * jax.random.normal(next(keys), shape)).astype(jnp.float32)

    idx = rel_position_index(ws).reshape(-1)
    blocks = []
    for _ in range(depth):
        table = nrm((tbl, num_heads))
        rel_bias = jnp.asarray(table)[idx].reshape(N, N, num_heads).transpose(2, 0, 1)
        blocks.append(dict(
            norm1_g=jnp.ones((1, dim), jnp.float32), norm1_b=jnp.zeros((1, dim), jnp.float32),
            qkv_w=nrm((dim, 3 * dim)), qkv_b=nrm((1, 3 * dim)),
            rel_bias=rel_bias,
            proj_w=nrm((dim, dim)), proj_b=nrm((1, dim)),
            norm2_g=jnp.ones((1, dim), jnp.float32), norm2_b=jnp.zeros((1, dim), jnp.float32),
            fc1_w=nrm((dim, hidden)), fc1_b=nrm((1, hidden)),
            fc2_w=nrm((hidden, dim)), fc2_b=nrm((1, dim)),
        ))
    upsample = dict(
        expand_w=nrm((dim, 2 * dim)),                       # nn.Linear(dim, 2*dim, bias=False)
        norm_g=jnp.ones((1, dim // 2), jnp.float32),
        norm_b=jnp.zeros((1, dim // 2), jnp.float32),
    )
    return dict(blocks=blocks, upsample=upsample)


def prepare_params(params, num_heads):
    """One-time host-side prep: bf16 matmul weights, softmax scale folded into q, permuted expand weight."""
    blocks = []
    for blk in params['blocks']:
        C = blk['qkv_w'].shape[0]
        hd = C // num_heads
        scale = hd ** -0.5
        qs = jnp.concatenate([jnp.full((C,), scale, jnp.float32),
                              jnp.ones((2 * C,), jnp.float32)])
        blocks.append(dict(
            blk,
            qkv_w=(blk['qkv_w'] * qs[None, :]).astype(jnp.bfloat16),
            qkv_b=blk['qkv_b'] * qs[None, :],
            proj_w=blk['proj_w'].astype(jnp.bfloat16),
            fc1_w=blk['fc1_w'].astype(jnp.bfloat16),
            fc2_w=blk['fc2_w'].astype(jnp.bfloat16),
        ))
    up = params['upsample']
    C, C2 = up['expand_w'].shape
    co = C2 // 4
    # permute columns: orig col = c*4 + k  ->  new col = k*co + c  (pure layout plumbing)
    ew = up['expand_w'].reshape(C, co, 4).transpose(0, 2, 1).reshape(C, C2).astype(jnp.bfloat16)
    return dict(blocks=blocks, upsample=dict(up, expand_w=ew))


# ---------------------------- main ----------------------------

if __name__ == "__main__":
    B, H, W = 2, 8, 8
    dim, depth, num_heads, window_size = 32, 2, 2, 4

    key = jax.random.PRNGKey(0)
    kx, kp = jax.random.split(key)
    x = jax.random.normal(kx, (B, H * W, dim), jnp.float32)
    params = init_params(kp, dim, depth, num_heads, window_size)
    pparams = prepare_params(params, num_heads)

    out, Ho, Wo = basic_layer_up(
        x, H, W, pparams, depth=depth, num_heads=num_heads, window_size=window_size,
        block_fn=swin_block_pl, expand_fn=expand_pl)
    out = jax.block_until_ready(out)
    assert out.shape == (B, 4 * H * W, dim // 2) and (Ho, Wo) == (2 * H, 2 * W)

    ref, _, _ = basic_layer_up(
        x, H, W, params, depth=depth, num_heads=num_heads, window_size=window_size,
        block_fn=swin_block_ref, expand_fn=expand_ref)
    # Pallas path uses bf16 MXU inputs / bf16 attention stream with f32 accumulation.
    np.testing.assert_allclose(np.asarray(out), np.asarray(ref), rtol=5e-2, atol=5e-2)

    print("KERNEL_OK")
</pallas_src>

<mosaic_0001>
module attributes {stable_mosaic.version = 11 : i64} {
  func.func @_attn_kernel(%arg0: i32, %arg1: i32, %arg2: memref<1x4x8x32xf32, #tpu.memory_space<vmem>>, %arg3: memref<1x32xf32, #tpu.memory_space<vmem>>, %arg4: memref<1x32xf32, #tpu.memory_space<vmem>>, %arg5: memref<32x96xbf16, #tpu.memory_space<vmem>>, %arg6: memref<1x96xf32, #tpu.memory_space<vmem>>, %arg7: memref<2x16x16xf32, #tpu.memory_space<vmem>>, %arg8: memref<32x32xbf16, #tpu.memory_space<vmem>>, %arg9: memref<1x32xf32, #tpu.memory_space<vmem>>, %arg10: memref<1x4x8x32xbf16, #tpu.memory_space<vmem>>) attributes {dimension_semantics = [#tpu.dimension_semantics<parallel>, #tpu.dimension_semantics<parallel>], iteration_bounds = array<i64: 2, 2>, scalar_prefetch = 0 : i64, scratch_operands = 0 : i64, tpu.core_type = #tpu.core_type<tc>, window_params = [{transform_indices = @transform_0, window_bounds = array<i64: 1, 4, 8, 32>}, {pipeline_mode = #tpu.pipeline_mode<synchronous>, transform_indices = @transform_1, window_bounds = array<i64: 1, 32>}, {pipeline_mode = #tpu.pipeline_mode<synchronous>, transform_indices = @transform_2, window_bounds = array<i64: 1, 32>}, {pipeline_mode = #tpu.pipeline_mode<synchronous>, transform_indices = @transform_3, window_bounds = array<i64: 32, 96>}, {pipeline_mode = #tpu.pipeline_mode<synchronous>, transform_indices = @transform_4, window_bounds = array<i64: 1, 96>}, {pipeline_mode = #tpu.pipeline_mode<synchronous>, transform_indices = @transform_5, window_bounds = array<i64: 2, 16, 16>}, {pipeline_mode = #tpu.pipeline_mode<synchronous>, transform_indices = @transform_6, window_bounds = array<i64: 32, 32>}, {pipeline_mode = #tpu.pipeline_mode<synchronous>, transform_indices = @transform_7, window_bounds = array<i64: 1, 32>}, {transform_indices = @transform_8, window_bounds = array<i64: 1, 4, 8, 32>}]} {
    %c0 = arith.constant 0 : index
    %c0_0 = arith.constant 0 : index
    %c0_1 = arith.constant 0 : index
    %c0_2 = arith.constant 0 : index
    %0 = vector.load %arg2[%c0, %c0_0, %c0_1, %c0_2] : memref<1x4x8x32xf32, #tpu.memory_space<vmem>>, vector<1x4x8x32xf32>
    %cst = arith.constant dense<0.000000e+00> : vector<1x4x8xf32>
    %1 = vector.multi_reduction <add>, %0, %cst [3] : vector<1x4x8x32xf32> to vector<1x4x8xf32>
    %2 = vector.shape_cast %1 : vector<1x4x8xf32> to vector<1x4x8x1xf32>
    %cst_3 = arith.constant 3.200000e+01 : f32
    %3 = vector.broadcast %cst_3 : f32 to vector<1x4x8x1xf32>
    %4 = arith.divf %2, %3 : vector<1x4x8x1xf32>
    %5 = vector.broadcast %4 : vector<1x4x8x1xf32> to vector<1x4x8x32xf32>
    %6 = arith.subf %0, %5 : vector<1x4x8x32xf32>
    %7 = arith.mulf %6, %6 : vector<1x4x8x32xf32>
    %cst_4 = arith.constant dense<0.000000e+00> : vector<1x4x8xf32>
    %8 = vector.multi_reduction <add>, %7, %cst_4 [3] : vector<1x4x8x32xf32> to vector<1x4x8xf32>
    %9 = vector.shape_cast %8 : vector<1x4x8xf32> to vector<1x4x8x1xf32>
    %cst_5 = arith.constant 3.200000e+01 : f32
    %10 = vector.broadcast %cst_5 : f32 to vector<1x4x8x1xf32>
    %11 = arith.divf %9, %10 : vector<1x4x8x1xf32>
    %12 = vector.broadcast %4 : vector<1x4x8x1xf32> to vector<1x4x8x32xf32>
    %13 = arith.subf %0, %12 : vector<1x4x8x32xf32>
    %cst_6 = arith.constant 9.99999974E-6 : f32
    %14 = vector.broadcast %cst_6 : f32 to vector<1x4x8x1xf32>
    %15 = arith.addf %11, %14 : vector<1x4x8x1xf32>
    %16 = math.rsqrt %15 : vector<1x4x8x1xf32>
    %17 = vector.broadcast %16 : vector<1x4x8x1xf32> to vector<1x4x8x32xf32>
    %18 = arith.mulf %13, %17 : vector<1x4x8x32xf32>
    %c0_7 = arith.constant 0 : index
    %c0_8 = arith.constant 0 : index
    %19 = vector.load %arg3[%c0_7, %c0_8] : memref<1x32xf32, #tpu.memory_space<vmem>>, vector<1x32xf32>
    %20 = vector.shape_cast %19 : vector<1x32xf32> to vector<1x1x1x32xf32>
    %21 = vector.broadcast %20 : vector<1x1x1x32xf32> to vector<1x4x8x32xf32>
    %22 = arith.mulf %18, %21 : vector<1x4x8x32xf32>
    %c0_9 = arith.constant 0 : index
    %c0_10 = arith.constant 0 : index
    %23 = vector.load %arg4[%c0_9, %c0_10] : memref<1x32xf32, #tpu.memory_space<vmem>>, vector<1x32xf32>
    %24 = vector.shape_cast %23 : vector<1x32xf32> to vector<1x1x1x32xf32>
    %25 = vector.broadcast %24 : vector<1x1x1x32xf32> to vector<1x4x8x32xf32>
    %26 = arith.addf %22, %25 : vector<1x4x8x32xf32>
    %27 = vector.extract_strided_slice %26 {offsets = [0, 0, 0, 0], sizes = [1, 4, 4, 32], strides = [1, 1, 1, 1]} : vector<1x4x8x32xf32> to vector<1x4x4x32xf32>
    %28 = vector.shape_cast %27 : vector<1x4x4x32xf32> to vector<4x4x32xf32>
    %29 = vector.shape_cast %28 : vector<4x4x32xf32> to vector<1x16x32xf32>
    %30 = vector.extract_strided_slice %26 {offsets = [0, 0, 4, 0], sizes = [1, 4, 4, 32], strides = [1, 1, 1, 1]} : vector<1x4x8x32xf32> to vector<1x4x4x32xf32>
    %31 = vector.shape_cast %30 : vector<1x4x4x32xf32> to vector<4x4x32xf32>
    %32 = vector.shape_cast %31 : vector<4x4x32xf32> to vector<1x16x32xf32>
    %33 = tpu.concatenate %29, %32 in 0 : vector<1x16x32xf32>, vector<1x16x32xf32> -> vector<2x16x32xf32>
    %34 = vector.shape_cast %33 : vector<2x16x32xf32> to vector<32x32xf32>
    %35 = arith.truncf %34 : vector<32x32xf32> to vector<32x32xbf16>
    %c0_11 = arith.constant 0 : index
    %c0_12 = arith.constant 0 : index
    %36 = vector.load %arg5[%c0_11, %c0_12] : memref<32x96xbf16, #tpu.memory_space<vmem>>, vector<32x96xbf16>
    %cst_13 = arith.constant dense<0.000000e+00> : vector<32x96xf32>
    %37 = tpu.matmul %35, %36, %cst_13 {dimension_numbers = #tpu.dot_dimension_numbers<[1], [0], [0], [1], [0, 0, 1, 1], [], []>} : vector<32x32xbf16>, vector<32x96xbf16>, vector<32x96xf32> -> vector<32x96xf32>
    %c0_14 = arith.constant 0 : index
    %c0_15 = arith.constant 0 : index
    %38 = vector.load %arg6[%c0_14, %c0_15] : memref<1x96xf32, #tpu.memory_space<vmem>>, vector<1x96xf32>
    %39 = vector.broadcast %38 : vector<1x96xf32> to vector<32x96xf32>
    %40 = arith.addf %37, %39 : vector<32x96xf32>
    %41 = arith.truncf %40 : vector<32x96xf32> to vector<32x96xbf16>
    %c0_16 = arith.constant 0 : index
    %c0_17 = arith.constant 0 : index
    %c0_18 = arith.constant 0 : index
    %42 = vector.load %arg7[%c0_16, %c0_17, %c0_18] : memref<2x16x16xf32, #tpu.memory_space<vmem>>, vector<2x16x16xf32>
    %43 = vector.extract_strided_slice %41 {offsets = [0, 0], sizes = [32, 16], strides = [1, 1]} : vector<32x96xbf16> to vector<32x16xbf16>
    %44 = vector.shape_cast %43 : vector<32x16xbf16> to vector<2x16x16xbf16>
    %45 = vector.extract_strided_slice %41 {offsets = [0, 32], sizes = [32, 16], strides = [1, 1]} : vector<32x96xbf16> to vector<32x16xbf16>
    %46 = vector.shape_cast %45 : vector<32x16xbf16> to vector<2x16x16xbf16>
    %47 = vector.extract_strided_slice %41 {offsets = [0, 64], sizes = [32, 16], strides = [1, 1]} : vector<32x96xbf16> to vector<32x16xbf16>
    %48 = vector.shape_cast %47 : vector<32x16xbf16> to vector<2x16x16xbf16>
    "tpu.trace_start"() <{level = 10 : i32, message = "wnd,wmd->wnm"}> : () -> ()
    %cst_19 = arith.constant dense<0.000000e+00> : vector<2x16x16xf32>
    %49 = tpu.matmul %44, %46, %cst_19 {dimension_numbers = #tpu.dot_dimension_numbers<[2], [2], [1], [1], [0, 0, 0, 1, 1, 1], [0], [0]>} : vector<2x16x16xbf16>, vector<2x16x16xbf16>, vector<2x16x16xf32> -> vector<2x16x16xf32>
    "tpu.trace_stop"() : () -> ()
    %50 = vector.extract_strided_slice %42 {offsets = [0, 0, 0], sizes = [1, 16, 16], strides = [1, 1, 1]} : vector<2x16x16xf32> to vector<1x16x16xf32>
    %51 = vector.shape_cast %50 : vector<1x16x16xf32> to vector<16x16xf32>
    %52 = vector.shape_cast %51 : vector<16x16xf32> to vector<1x16x16xf32>
    %53 = vector.broadcast %52 : vector<1x16x16xf32> to vector<2x16x16xf32>
    %54 = arith.addf %49, %53 : vector<2x16x16xf32>
    %cst_20 = arith.constant dense<0xFF800000> : vector<2x16xf32>
    %55 = vector.multi_reduction <maximumf>, %54, %cst_20 [2] : vector<2x16x16xf32> to vector<2x16xf32>
    %56 = vector.shape_cast %55 : vector<2x16xf32> to vector<2x16x1xf32>
    %57 = vector.broadcast %56 : vector<2x16x1xf32> to vector<2x16x16xf32>
    %58 = arith.subf %54, %57 : vector<2x16x16xf32>
    %59 = math.exp %58 : vector<2x16x16xf32>
    %cst_21 = arith.constant dense<0.000000e+00> : vector<2x16xf32>
    %60 = vector.multi_reduction <add>, %59, %cst_21 [2] : vector<2x16x16xf32> to vector<2x16xf32>
    %61 = vector.shape_cast %60 : vector<2x16xf32> to vector<2x16x1xf32>
    %62 = tpu.reciprocal %61 : vector<2x16x1xf32> -> vector<2x16x1xf32>
    %63 = vector.broadcast %62 : vector<2x16x1xf32> to vector<2x16x16xf32>
    %64 = arith.mulf %59, %63 : vector<2x16x16xf32>
    %65 = arith.truncf %64 : vector<2x16x16xf32> to vector<2x16x16xbf16>
    "tpu.trace_start"() <{level = 10 : i32, message = "wnm,wmd->wnd"}> : () -> ()
    %cst_22 = arith.constant dense<0.000000e+00> : vector<2x16x16xf32>
    %66 = tpu.matmul %65, %48, %cst_22 {dimension_numbers = #tpu.dot_dimension_numbers<[2], [1], [1], [2], [0, 0, 0, 1, 1, 2], [0], [0]>} : vector<2x16x16xbf16>, vector<2x16x16xbf16>, vector<2x16x16xf32> -> vector<2x16x16xf32>
    "tpu.trace_stop"() : () -> ()
    %67 = arith.truncf %66 : vector<2x16x16xf32> to vector<2x16x16xbf16>
    %68 = vector.extract_strided_slice %41 {offsets = [0, 16], sizes = [32, 16], strides = [1, 1]} : vector<32x96xbf16> to vector<32x16xbf16>
    %69 = vector.shape_cast %68 : vector<32x16xbf16> to vector<2x16x16xbf16>
    %70 = vector.extract_strided_slice %41 {offsets = [0, 48], sizes = [32, 16], strides = [1, 1]} : vector<32x96xbf16> to vector<32x16xbf16>
    %71 = vector.shape_cast %70 : vector<32x16xbf16> to vector<2x16x16xbf16>
    %72 = vector.extract_strided_slice %41 {offsets = [0, 80], sizes = [32, 16], strides = [1, 1]} : vector<32x96xbf16> to vector<32x16xbf16>
    %73 = vector.shape_cast %72 : vector<32x16xbf16> to vector<2x16x16xbf16>
    "tpu.trace_start"() <{level = 10 : i32, message = "wnd,wmd->wnm"}> : () -> ()
    %cst_23 = arith.constant dense<0.000000e+00> : vector<2x16x16xf32>
    %74 = tpu.matmul %69, %71, %cst_23 {dimension_numbers = #tpu.dot_dimension_numbers<[2], [2], [1], [1], [0, 0, 0, 1, 1, 1], [0], [0]>} : vector<2x16x16xbf16>, vector<2x16x16xbf16>, vector<2x16x16xf32> -> vector<2x16x16xf32>
    "tpu.trace_stop"() : () -> ()
    %75 = vector.extract_strided_slice %42 {offsets = [1, 0, 0], sizes = [1, 16, 16], strides = [1, 1, 1]} : vector<2x16x16xf32> to vector<1x16x16xf32>
    %76 = vector.shape_cast %75 : vector<1x16x16xf32> to vector<16x16xf32>
    %77 = vector.shape_cast %76 : vector<16x16xf32> to vector<1x16x16xf32>
    %78 = vector.broadcast %77 : vector<1x16x16xf32> to vector<2x16x16xf32>
    %79 = arith.addf %74, %78 : vector<2x16x16xf32>
    %cst_24 = arith.constant dense<0xFF800000> : vector<2x16xf32>
    %80 = vector.multi_reduction <maximumf>, %79, %cst_24 [2] : vector<2x16x16xf32> to vector<2x16xf32>
    %81 = vector.shape_cast %80 : vector<2x16xf32> to vector<2x16x1xf32>
    %82 = vector.broadcast %81 : vector<2x16x1xf32> to vector<2x16x16xf32>
    %83 = arith.subf %79, %82 : vector<2x16x16xf32>
    %84 = math.exp %83 : vector<2x16x16xf32>
    %cst_25 = arith.constant dense<0.000000e+00> : vector<2x16xf32>
    %85 = vector.multi_reduction <add>, %84, %cst_25 [2] : vector<2x16x16xf32> to vector<2x16xf32>
    %86 = vector.shape_cast %85 : vector<2x16xf32> to vector<2x16x1xf32>
    %87 = tpu.reciprocal %86 : vector<2x16x1xf32> -> vector<2x16x1xf32>
    %88 = vector.broadcast %87 : vector<2x16x1xf32> to vector<2x16x16xf32>
    %89 = arith.mulf %84, %88 : vector<2x16x16xf32>
    %90 = arith.truncf %89 : vector<2x16x16xf32> to vector<2x16x16xbf16>
    "tpu.trace_start"() <{level = 10 : i32, message = "wnm,wmd->wnd"}> : () -> ()
    %cst_26 = arith.constant dense<0.000000e+00> : vector<2x16x16xf32>
    %91 = tpu.matmul %90, %73, %cst_26 {dimension_numbers = #tpu.dot_dimension_numbers<[2], [1], [1], [2], [0, 0, 0, 1, 1, 2], [0], [0]>} : vector<2x16x16xbf16>, vector<2x16x16xbf16>, vector<2x16x16xf32> -> vector<2x16x16xf32>
    "tpu.trace_stop"() : () -> ()
    %92 = arith.truncf %91 : vector<2x16x16xf32> to vector<2x16x16xbf16>
    %93 = tpu.concatenate %67, %92 in 2 : vector<2x16x16xbf16>, vector<2x16x16xbf16> -> vector<2x16x32xbf16>
    %94 = vector.shape_cast %93 : vector<2x16x32xbf16> to vector<32x32xbf16>
    %c0_27 = arith.constant 0 : index
    %c0_28 = arith.constant 0 : index
    %95 = vector.load %arg8[%c0_27, %c0_28] : memref<32x32xbf16, #tpu.memory_space<vmem>>, vector<32x32xbf16>
    %cst_29 = arith.constant dense<0.000000e+00> : vector<32x32xf32>
    %96 = tpu.matmul %94, %95, %cst_29 {dimension_numbers = #tpu.dot_dimension_numbers<[1], [0], [0], [1], [0, 0, 1, 1], [], []>} : vector<32x32xbf16>, vector<32x32xbf16>, vector<32x32xf32> -> vector<32x32xf32>
    %c0_30 = arith.constant 0 : index
    %c0_31 = arith.constant 0 : index
    %97 = vector.load %arg9[%c0_30, %c0_31] : memref<1x32xf32, #tpu.memory_space<vmem>>, vector<1x32xf32>
    %98 = vector.broadcast %97 : vector<1x32xf32> to vector<32x32xf32>
    %99 = arith.addf %96, %98 : vector<32x32xf32>
    %100 = vector.extract_strided_slice %99 {offsets = [0, 0], sizes = [16, 32], strides = [1, 1]} : vector<32x32xf32> to vector<16x32xf32>
    %101 = vector.shape_cast %100 : vector<16x32xf32> to vector<4x4x32xf32>
    %102 = vector.extract_strided_slice %99 {offsets = [16, 0], sizes = [16, 32], strides = [1, 1]} : vector<32x32xf32> to vector<16x32xf32>
    %103 = vector.shape_cast %102 : vector<16x32xf32> to vector<4x4x32xf32>
    %104 = vector.shape_cast %101 : vector<4x4x32xf32> to vector<4x1x4x32xf32>
    %105 = vector.shape_cast %103 : vector<4x4x32xf32> to vector<4x1x4x32xf32>
    %106 = tpu.concatenate %104, %105 in 1 : vector<4x1x4x32xf32>, vector<4x1x4x32xf32> -> vector<4x2x4x32xf32>
    %107 = vector.shape_cast %106 : vector<4x2x4x32xf32> to vector<4x8x32xf32>
    %108 = vector.shape_cast %107 : vector<4x8x32xf32> to vector<1x4x8x32xf32>
    %109 = arith.truncf %108 : vector<1x4x8x32xf32> to vector<1x4x8x32xbf16>
    %c0_32 = arith.constant 0 : index
    %c0_33 = arith.constant 0 : index
    %c0_34 = arith.constant 0 : index
    %c0_35 = arith.constant 0 : index
    %110 = vector.load %arg10[%c0_32, %c0_33, %c0_34, %c0_35] : memref<1x4x8x32xbf16, #tpu.memory_space<vmem>>, vector<1x4x8x32xbf16>
    tpu.vector_store %arg10[%c0_32, %c0_33, %c0_34, %c0_35], %109 {strides = array<i32>} : memref<1x4x8x32xbf16, #tpu.memory_space<vmem>>, vector<1x4x8x32xbf16>,
    return
  }
  func.func @transform_0(%arg0: i32, %arg1: i32) -> (i32, i32, i32, i32) {
    %c0_i32 = arith.constant 0 : i32
    %c0_i32_0 = arith.constant 0 : i32
    %c0_i32_1 = arith.constant 0 : i32
    return %arg0, %arg1, %c0_i32, %c0_i32_0 : i32, i32, i32, i32
  }
  func.func @transform_1(%arg0: i32, %arg1: i32) -> (i32, i32) {
    %c0_i32 = arith.constant 0 : i32
    %c0_i32_0 = arith.constant 0 : i32
    %c0_i32_1 = arith.constant 0 : i32
    return %c0_i32, %c0_i32_0 : i32, i32
  }
  func.func @transform_2(%arg0: i32, %arg1: i32) -> (i32, i32) {
    %c0_i32 = arith.constant 0 : i32
    %c0_i32_0 = arith.constant 0 : i32
    %c0_i32_1 = arith.constant 0 : i32
    return %c0_i32, %c0_i32_0 : i32, i32
  }
  func.func @transform_3(%arg0: i32, %arg1: i32) -> (i32, i32) {
    %c0_i32 = arith.constant 0 : i32
    %c0_i32_0 = arith.constant 0 : i32
    %c0_i32_1 = arith.constant 0 : i32
    return %c0_i32, %c0_i32_0 : i32, i32
  }
  func.func @transform_4(%arg0: i32, %arg1: i32) -> (i32, i32) {
    %c0_i32 = arith.constant 0 : i32
    %c0_i32_0 = arith.constant 0 : i32
    %c0_i32_1 = arith.constant 0 : i32
    return %c0_i32, %c0_i32_0 : i32, i32
  }
  func.func @transform_5(%arg0: i32, %arg1: i32) -> (i32, i32, i32) {
    %c0_i32 = arith.constant 0 : i32
    %c0_i32_0 = arith.constant 0 : i32
    %c0_i32_1 = arith.constant 0 : i32
    %c0_i32_2 = arith.constant 0 : i32
    return %c0_i32, %c0_i32_0, %c0_i32_1 : i32, i32, i32
  }
  func.func @transform_6(%arg0: i32, %arg1: i32) -> (i32, i32) {
    %c0_i32 = arith.constant 0 : i32
    %c0_i32_0 = arith.constant 0 : i32
    %c0_i32_1 = arith.constant 0 : i32
    return %c0_i32, %c0_i32_0 : i32, i32
  }
  func.func @transform_7(%arg0: i32, %arg1: i32) -> (i32, i32) {
    %c0_i32 = arith.constant 0 : i32
    %c0_i32_0 = arith.constant 0 : i32
    %c0_i32_1 = arith.constant 0 : i32
    return %c0_i32, %c0_i32_0 : i32, i32
  }
  func.func @transform_8(%arg0: i32, %arg1: i32) -> (i32, i32, i32, i32) {
    %c0_i32 = arith.constant 0 : i32
    %c0_i32_0 = arith.constant 0 : i32
    %c0_i32_1 = arith.constant 0 : i32
    return %arg0, %arg1, %c0_i32, %c0_i32_0 : i32, i32, i32, i32
  }
}

</mosaic_0001>

<bundles_post_ra>
// kernel: tpu_custom_call.1
= control target key start
LH: loop header
LB: loop body
LE: loop exit
PB: predicated region body
PF: predicated region fallthrough
CT: control target
= control target key end

     0   :  { %s2198_s0 = inlined_call_operand.hbm [shape: f32[2,8,8,32], index: 0, kind: input, shape index: {}]   ;;  %s2199_s1 = inlined_call_operand.hbm [shape: f32[1,32], index: 1, kind: input, shape index: {}]   ;;  %s2200_s2 = inlined_call_operand.vmem [shape: f32[1,32], index: 2, kind: input, shape index: {}]   ;;  %s2201_s3 = inlined_call_operand.hbm [shape: bf16[32,96], index: 3, kind: input, shape index: {}]   ;;  %s2202_s4 = inlined_call_operand.vmem [shape: f32[1,96], index: 4, kind: input, shape index: {}]   ;;  %s2203_s5 = inlined_call_operand.hbm [shape: f32[2,16,16], index: 5, kind: input, shape index: {}]   ;;  %s2204_s6 = inlined_call_operand.hbm [shape: bf16[32,32], index: 6, kind: input, shape index: {}]   ;;  %s2205_s7 = inlined_call_operand.vmem [shape: f32[1,32], index: 7, kind: input, shape index: {}]   ;;  %s2206_s8 = inlined_call_operand.hbm [shape: bf16[2,8,8,32], index: 8, kind: output, shape index: {}]  }
   0x1   :  { %2215 = sst [smem:[#allocation22_spill]] %s2199_s1 }
   0x2   :  { %2216 = sst [smem:[#allocation23_spill]] %s2201_s3 }
   0x3   :  { %2217 = sst [smem:[#allocation24_spill]] %s2203_s5 }
   0x4   :  { %2218 = sst [smem:[#allocation25_spill]] %s2204_s6 }
   0x5   :  { %2219 = sst [smem:[#allocation26_spill]] %s2206_s8 }
   0x6   :  { %13 = vsyncpa [#allocation3], 0 }
   0x7   :  { %15 = vsyncpa [#allocation3 + $0x1], 0 }
   0x8   :  { %16 = vsyncpa [#allocation6], 0 }
   0x9   :  { %17 = vsyncpa [#allocation9], 0 }
   0xa   :  { %18 = vsyncpa [#allocation4], 0 }
   0xb   :  { %20 = vsyncpa [#allocation4 + $0x1], 0  ;;  %s1844_s27 = smov 0   ;;  %s1846_s28 = smov 0  }
   0xc   :  { %s1848_s29 = smov 0   ;;  %s1850_s30 = smov 0  }
   0xd   :  { %s1852_s9 = smov 0   ;;  %s1854_s10 = smov 0  }
   0xe   :  { %s1856_s11 = smov 0   ;;  %s1858_s12 = smov 0  }
   0xf LB: > { %2220 = sst [smem:[#allocation16_spill]] %s1753_s27  ;;  %s1291_s13 = sadd.s32 4294967295, %s1781_s12   ;;  %s1781_s12 = sphi %s1858_s12, %s26_s12   ;;  %s1777_s11 = sphi %s1856_s11, %s2255_s11   ;;  %s1773_s10 = sphi %s1854_s10, %s2254_s10   ;;  %s1769_s9 = sphi %s1852_s9, %s2253_s9   ;;  %s1765_s30 = sphi %s1850_s30, %s2252_s30   ;;  %s1761_s29 = sphi %s1848_s29, %s2251_s29   ;;  %s1757_s28 = sphi %s1846_s28, %s2250_s28   ;;  %s1753_s27 = sphi %s1844_s27, %s2249_s27  }
  0x10   : > { %2221 = sst [smem:[#allocation17_spill]] %s1765_s30  ;;  %s1292_s14 = sadd.s32 4294967294, %s1781_s12  }
  0x11   : > { %2222 = sst [smem:[#allocation18_spill]] %s1769_s9  ;;  %p60_p0 = scmp.ne.s32.totalorder %s1757_s28, %s1753_s27 }
  0x12   : > { %p1888_p1 = scmp.eq.s32.totalorder %s1291_s13, 0  ;;  %p1892_p2 = scmp.eq.s32.totalorder %s1291_s13, 3 }
  0x13   : > { %p239_p3 = scmp.eq.s32.totalorder %s1292_s14, 3  ;;  %p1293_p5 = scmp.ge.s32.totalorder %s1781_s12, 1 }
  0x14   : > { %p1898_p4 = por %p1888_p1, %p60_p0  ;;  %p246_p7 = scmp.lt.s32.totalorder %s1781_s12, 5 }
  0x15   : > { %p1903_p6 = por %p239_p3, %p60_p0  ;;  %s2228_s1 = sld [smem:[#allocation22_spill]] }
  0x16   : > { %p1911_p8 = pnand %p1293_p5, %p246_p7  ;;  %s1783_s23 = smov [#allocation5]  }
  0x17   : > { %s2226_s18 = scalar_select %p1903_p6, 1, 0 }
  0x18   : > { %p1368_p9 = pneg %p1911_p8  ;;  %s260_s24 = sshll.u32 %s1783_s23, 4  ;;  %s261_s24 = int_to_ptr.vmem [resolvable:$true] %s260_s24 }
  0x19   : > { %2227 = sst [smem:[#allocation19_spill]] %s2226_s18  ;;  %s1784_s19 = smov [#allocation8]  }
  0x1a   : > { %s2230_s5 = sld [smem:[#allocation24_spill]]  ;;  %p1922_p10 = pnand %p1368_p9, %p1888_p1 }
  0x1b   : > { %s258_s21 = sshll.u32 %s2228_s1, 4  ;;  %s291_s20 = sshll.u32 %s1784_s19, 4  ;;  %s259_s21 = int_to_ptr.hbm [resolvable:$true] %s258_s21  ;;  %s292_s20 = int_to_ptr.vmem [resolvable:$true] %s291_s20 }
  0x1c   : > { %1371 = dma.hbm_to_vmem [thread:$0]  (!%p1922_p10), %s259_s21, 16, %s261_s24, [#allocation6]  }
  0x1d   : > { %s2210_s23 = smov 128   ;;  %s2211_s1 = smov 8  }
  0x1e   : > { %s2232_s3 = sld [smem:[#allocation23_spill]]  ;;  %s1787_s19 = smov [#allocation7]  }
  0x1f   : > { %s274_s21 = sshll.u32 %s1787_s19, 4  ;;  %s2233_s6 = sld [smem:[#allocation25_spill]]  ;;  %s275_s21 = int_to_ptr.vmem [resolvable:$true] %s274_s21 }
  0x20   : > { %s289_s13 = sshll.u32 %s2230_s5, 4  ;;  %s1788_s8 = smov 64   ;;  %s290_s13 = int_to_ptr.hbm [resolvable:$true] %s289_s13 }
  0x21   : > { %1377 = dma.hbm_to_vmem [thread:$0]  (!%p1922_p10), %s290_s13, 512, %s292_s20, [#allocation9], %s2210_s23, %s2210_s23, %s2211_s1  }
  0x22   : > { %s1789_s13 = smov 4   ;;  %s1790_s20 = smov [#allocation10]  }
  0x23   : > { %s305_s25 = sshll.u32 %s1790_s20, 4  ;;  %s35_s26 = sadd.s32 1, %s1773_s10  ;;  %s306_s25 = int_to_ptr.vmem [resolvable:$true] %s305_s25 }
  0x24   : > { %s272_s5 = sshll.u32 %s2232_s3, 4  ;;  %s38_s19 = sadd.s32 1, %s1777_s11  ;;  %s273_s5 = int_to_ptr.hbm [resolvable:$true] %s272_s5 }
  0x25   : > { %s303_s27 = sshll.u32 %s2233_s6, 4  ;;  %p36_p11 = scmp.ge.s32.totalorder %s35_s26, 2  ;;  %s304_s27 = int_to_ptr.hbm [resolvable:$true] %s303_s27 }
  0x26   : > { %1374 = dma.hbm_to_vmem [thread:$0]  (!%p1922_p10), %s273_s5, 256, %s275_s21, [#allocation6], %s1788_s8, %s1788_s8, %s1789_s13  }
  0x27   : > { %1380 = dma.hbm_to_vmem [thread:$0]  (!%p1922_p10), %s304_s27, 256, %s306_s25, [#allocation9], %s1788_s8, %s1788_s8, %s1789_s13  }
  0x28   : > { %s47_s18 = sadd.s32 1, %s1761_s29  ;;  %p54_p12 = scmp.ne.s32.totalorder %s1761_s29, %s1757_s28 }
  0x29   : > { %p55_p13 = scmp.eq.s32.totalorder %s1781_s12, 0  ;;  %s2257_s26 = smov (%p36_p11, %s35_s26), 0 }
  0x2a   : > { %2234 = sst [smem:[#allocation20_spill]] %s2257_s26  ;;  %s2259_s19 = smov (!%p36_p11, %s38_s19), %s1777_s11 }
  0x2b   : > { %s43_s5 = ssub.s32 %s1773_s10, %s2257_s26  ;;  %p1954_p0 = por %p55_p13, %p54_p12 }
  0x2c   : > { %p40_p3 = scmp.ge.s32.totalorder %s2259_s19, 2  ;;  %p1960_p5 = por %p1892_p2, %p54_p12 }
  0x2d   : > { %p1393_p7 = scmp.lt.s32.totalorder %s1781_s12, 4  ;;  %s322_s27 = sand.u32 1, %s1761_s29  }
  0x2e   : > { %s2236_s8 = scalar_select %p1960_p5, 1, 0 }
  0x2f   : > { %s2261_s19 = smov (%p40_p3, %s2259_s19), 0  ;;  %s1299_s14 = sshll.u32 %s322_s27, 5 }
  0x30   : > { %2237 = sst [smem:[#allocation21_spill]] %s2236_s8  ;;  %s42_s24 = ssub.s32 %s1777_s11, %s2261_s19 }
  0x31   : > { %s44_s13 = sor.u32 %s43_s5, %s42_s24  ;;  %s1300_s20 = sshll.u32 %s1773_s10, 2 }
  0x32   : > { %p45_p9 = scmp.eq.s32.totalorder %s44_s13, 0  ;;  %s1301_s25 = sshll.u32 %s1777_s11, 3 }
  0x33   : > { %s331_s23 = sadd.s32 %s1301_s25, %s1300_s20  ;;  %s326_s1 = scalar_lea.vmem [#allocation2], %s1299_s14 }
  0x34   : > { %s336_s16 = sshll.u32 %s326_s1, 4  ;;  %s1302_s6 = sshll.u32 %s331_s23, 3  ;;  %s337_s16 = int_to_ptr.vmem [resolvable:$true] %s336_s16 }
  0x35   : > { %s1973_s3 = scalar_select %p45_p9, %s1761_s29, %s47_s18  }
  0x36   : > { %s333_s9 = scalar_lea.hbm %s2198_s0, %s1302_s6  ;;  %p1382_p2 = pnand %p1393_p7, %p1954_p0 }
  0x37   : > { %s334_s30 = sshll.u32 %s333_s9, 4  ;;  %s323_s5 = scalar_lea.sflag [#allocation3], %s322_s27  ;;  %s335_s30 = int_to_ptr.hbm [resolvable:$true] %s334_s30 }
  0x38   : > { %s2238_s24 = smov 8   ;;  %s2239_s13 = smov 128  }
  0x39   : > { %1384 = dma.hbm_to_vmem [thread:$0]  (!%p1382_p2), %s335_s30, 512, %s337_s16, %s323_s5, %s2239_s13, %s2239_s13, %s2238_s24  }
  0x3a   : > { %348 = sbr.rel (%p1911_p8) target bundleno = 1505 (0x5e1), region = 52  ;;  %s1988_s1 = sand.u32 (!%p1911_p8), 1, %s1757_s28  }
  0x3b   : > { %s1304_s6 = sshll.u32 (!%p1911_p8), %s1988_s1, 5  ;;  %s351_s23 = scalar_lea.sflag (!%p1911_p8), [#allocation3], %s1988_s1 }
  0x3c   : > { %s354_s26 = scalar_lea.vmem (!%p1911_p8), [#allocation2], %s1304_s6 }
  0x3f   : > { %1736 = dma.done.wait (%p1898_p4), %s351_s23, 512  }
  0x40   : > { %1738 = vsyncadd (%p1898_p4), %s351_s23, 4294966784 }
  0x41   : > { %1740 = dma.done.wait (%p1888_p1), [#allocation6], 272  }
  0x42   : > { %1742 = vsyncadd (%p1888_p1), [#allocation6], 4294967024 }
  0x43   : > { %1744 = dma.done.wait (%p1888_p1), [#allocation9], 768  }
  0x44   : > { %1746 = vsyncadd (%p1888_p1), [#allocation9], 4294966528  ;;  %vm415_vm0 = vcmask 261120   ;;  %v413_v0 = vld [vmem:[%s354_s26 + $0x10] sm:$0xff]  ;;  %v411_v1 = vld [vmem:[%s354_s26] sm:$0xff]  ;;  %v1791_v8 = vmov 32.0  }
  0x45   : > { %v422_v2 = vsel %vm415_vm0, %v413_v0, 0.0  ;;  %v416_v3 = vsel %vm415_vm0, %v411_v1, 0.0  ;;  %v414_v4 = vld [vmem:[%s354_s26 + $0x18] sm:$0xff]  ;;  %v412_v5 = vld [vmem:[%s354_s26 + $0x8] sm:$0xff]  ;;  %1483 = vrcp.f32 %v1791_v8  ;;  %v1479_v63 = vld [vmem:[#allocation5] ss:$0 sm:$0xff] }
  0x46   : > { %423 = vadd.xlane.f32.xlu1 %v422_v2  ;;  %417 = vadd.xlane.f32.xlu0 %v416_v3  ;;  %v425_v6 = vsel %vm415_vm0, %v414_v4, 0.0  ;;  %v419_v7 = vsel %vm415_vm0, %v412_v5, 0.0  ;;  %v1345_v55 = vld [vmem:[#allocation7 + $0x8] sm:$0xff]  ;;  %v1344_v59 = vld [vmem:[#allocation7] sm:$0xff]  ;;  %s1792_s22 = smov 80   ;;  %s1793_s18 = smov 96  }
  0x47   : > { %600 = vmatpush.bf16.msra.mxu0 %v1345_v55  ;;  %s1794_s21 = smov 112   ;;  %vm628_vm14 = vcmask 130048   ;;  %s1795_s8 = smov 64  }
  0x48   : > { %s1796_s27 = smov 48   ;;  %s1797_s14 = smov 16  }
  0x49   : > { %s2242_s16 = sld [smem:[#allocation17_spill]]  ;;  %s1309_s6 = sshll.u32 %s1988_s1, 4 }
  0x4a   : > { %s2243_s5 = sld [smem:[#allocation18_spill]]  ;;  %s407_s30 = scalar_lea.vmem [#allocation11], %s1309_s6 }
  0x4b   : > { %v1484_v9 = vpop.eup %1483  ;;  %601 = vmatpush.bf16.msra.mxu0 %v1344_v59  ;;  %s2244_s17 = sld [smem:[#allocation26_spill]] }
  0x4c   : > { %v429_v10 = vmul.f32 32.0, %v1484_v9  ;;  %vm433_vm1 = vweird.f32 %v1484_v9 }
  0x4e   : > { %426 = vadd.xlane.f32.xlu1 %v425_v6  ;;  %420 = vadd.xlane.f32.xlu0 %v419_v7  ;;  %v430_v11 = vsub.f32 1.0, %v429_v10 }
  0x4f   : > { %s1339_s24 = sshll.u32 %s2242_s16, 2 }
  0x50   : > { %v431_v12 = vmul.f32 %v1484_v9, %v430_v11  ;;  %s1340_s13 = sshll.u32 %s2243_s5, 3 }
  0x51   : > { %s1157_s23 = sadd.s32 %s1340_s13, %s1339_s24  ;;  %s1695_s24 = scalar_lea.hbm %s2244_s17, 64 }
  0x52   : > { %v432_v13 = vadd.f32 %v1484_v9, %v431_v12  ;;  %s1341_s26 = sshll.u32 %s1157_s23, 2 }
  0x54   : > { %v434_v14 = vsel %vm433_vm1, %v1484_v9, %v432_v13 }
  0xb9   : > { %v424_v15 = vpop.xlane.xlu1 %423  ;;  %v418_v16 = vpop.xlane.xlu0 %417 }
  0xba   : > { %v437_v17 = vmul.f32 %v434_v14, %v424_v15  ;;  %v435_v18 = vmul.f32 %v434_v14, %v418_v16 }
  0xbc   : > { %v2008_v19 = vsub.f32 %v413_v0, %v437_v17  ;;  %v2010_v20 = vsub.f32 %v411_v1, %v435_v18 }
  0xbe   : > { %v445_v21 = vmul.f32 %v2008_v19, %v2008_v19  ;;  %v443_v22 = vmul.f32 %v2010_v20, %v2010_v20 }
  0xc0   : > { %v453_v23 = vsel %vm415_vm0, %v445_v21, 0.0  ;;  %v447_v24 = vsel %vm415_vm0, %v443_v22, 0.0 }
  0xc1   : > { %v427_v25 = vpop.xlane.xlu1 %426  ;;  %454 = vadd.xlane.f32.xlu0 %v453_v23  ;;  %448 = vadd.xlane.f32.xlu2 %v447_v24  ;;  %v421_v26 = vpop.xlane.xlu0 %420 }
  0xc2   : > { %v438_v27 = vmul.f32 %v434_v14, %v427_v25  ;;  %v436_v28 = vmul.f32 %v434_v14, %v421_v26 }
  0xc4   : > { %v2018_v29 = vsub.f32 %v414_v4, %v438_v27  ;;  %v2020_v30 = vsub.f32 %v412_v5, %v436_v28  ;;  %v1480_v4 = vld [vmem:[%s2200_s2] ss:$0 sm:$0xff] }
  0xc6   : > { %v446_v31 = vmul.f32 %v2018_v29, %v2018_v29  ;;  %v444_v32 = vmul.f32 %v2020_v30, %v2020_v30 }
  0xc8   : > { %v456_v33 = vsel %vm415_vm0, %v446_v31, 0.0  ;;  %v450_v34 = vsel %vm415_vm0, %v444_v32, 0.0 }
  0xc9   : > { %457 = vadd.xlane.f32.xlu1 %v456_v33  ;;  %451 = vadd.xlane.f32.xlu2 %v450_v34 }
 0x134   : > { %v449_v35 = vpop.xlane.xlu2 %448  ;;  %v455_v36 = vpop.xlane.xlu0 %454 }
 0x135   : > { %v459_v37 = vmul.f32 %v449_v35, %v434_v14  ;;  %v461_v38 = vmul.f32 %v455_v36, %v434_v14 }
 0x137   : > { %v463_v39 = vadd.f32 1e-05, %v459_v37  ;;  %v465_v40 = vadd.f32 1e-05, %v461_v38  ;;  %v1481_v38 = vld [vmem:[%s2202_s4] ss:$0 sm:$0xff] }
 0x139   : > { %1485 = vrsqrt.f32 %v463_v39  ;;  %vm493_vm3 = vweird.f32 %v465_v40  ;;  %vm473_vm5 = vweird.f32 %v463_v39 }
 0x13a   : > { %1487 = vrsqrt.f32 %v465_v40 }
 0x13c   : > { %v458_v41 = vpop.xlane.xlu1 %457  ;;  %v452_v42 = vpop.xlane.xlu2 %451 }
 0x13d   : > { %v462_v43 = vmul.f32 %v458_v41, %v434_v14  ;;  %v460_v44 = vmul.f32 %v452_v42, %v434_v14 }
 0x13f   : > { %v1486_v45 = vpop.eup %1485  ;;  %v466_v46 = vadd.f32 1e-05, %v462_v43  ;;  %v464_v47 = vadd.f32 1e-05, %v460_v44 }
 0x140   : > { %v1488_v48 = vpop.eup %1487  ;;  %v468_v49 = vmul.f32 %v1486_v45, %v463_v39  ;;  %vm474_vm2 = vweird.f32 %v1486_v45 }
 0x141   : > { %v488_v50 = vmul.f32 %v1488_v48, %v465_v40  ;;  %1489 = vrsqrt.f32 %v466_v46  ;;  %vm494_vm4 = vweird.f32 %v1488_v48  ;;  %vm475_vm6 = vmor %vm473_vm5, %vm474_vm2  ;;  %vm503_vm8 = vweird.f32 %v466_v46 }
 0x142   : > { %v469_v51 = vmul.f32 %v1486_v45, %v468_v49  ;;  %1491 = vrsqrt.f32 %v464_v47  ;;  %vm495_vm7 = vmor %vm493_vm3, %vm494_vm4  ;;  %vm483_vm12 = vweird.f32 %v464_v47 }
 0x143   : > { %v489_v52 = vmul.f32 %v1488_v48, %v488_v50 }
 0x144   : > { %v470_v53 = vmul.f32 0.5, %v469_v51 }
 0x145   : > { %v490_v54 = vmul.f32 0.5, %v489_v52 }
 0x146   : > { %v471_v56 = vsub.f32 1.5, %v470_v53 }
 0x147   : > { %v1490_v57 = vpop.eup %1489  ;;  %v491_v58 = vsub.f32 1.5, %v490_v54 }
 0x148   : > { %v1492_v60 = vpop.eup %1491  ;;  %v472_v61 = vmul.f32 %v1486_v45, %v471_v56  ;;  %v498_v62 = vmul.f32 %v1490_v57, %v466_v46  ;;  %vm504_vm9 = vweird.f32 %v1490_v57 }
 0x149   : > { %v492_v0 = vmul.f32 %v1488_v48, %v491_v58  ;;  %v478_v1 = vmul.f32 %v1492_v60, %v464_v47  ;;  %vm484_vm10 = vweird.f32 %v1492_v60  ;;  %vm505_vm11 = vmor %vm503_vm8, %vm504_vm9 }
 0x14a   : > { %v476_v2 = vsel %vm475_vm6, %v1486_v45, %v472_v61  ;;  %v499_v3 = vmul.f32 %v1490_v57, %v498_v62  ;;  %vm485_vm13 = vmor %vm483_vm12, %vm484_vm10 }
 0x14b   : > { %v507_v5 = vmul.f32 %v476_v2, %v2010_v20  ;;  %v496_v6 = vsel %vm495_vm7, %v1488_v48, %v492_v0  ;;  %v479_v7 = vmul.f32 %v1492_v60, %v478_v1  ;;  %v617_v2 = vld [vmem:[#allocation8] sm:$0xff] }
 0x14c   : > { %v509_v8 = vmul.f32 %v496_v6, %v2008_v19  ;;  %v500_v9 = vmul.f32 0.5, %v499_v3  ;;  %v618_v6 = vld [vmem:[#allocation8 + $0x8] sm:$0xff] }
 0x14d   : > { %v515_v10 = vmul.f32 %v1479_v63, %v507_v5  ;;  %v480_v11 = vmul.f32 0.5, %v479_v7 }
 0x14e   : > { %v517_v12 = vmul.f32 %v1479_v63, %v509_v8  ;;  %v501_v13 = vsub.f32 1.5, %v500_v9 }
 0x14f   : > { %v523_v14 = vadd.f32 %v1480_v4, %v515_v10  ;;  %v481_v15 = vsub.f32 1.5, %v480_v11  ;;  %v619_v10 = vld [vmem:[#allocation8 + $0x10] sm:$0xff] }
 0x150   : > { %v525_v16 = vadd.f32 %v1480_v4, %v517_v12  ;;  %v502_v17 = vmul.f32 %v1490_v57, %v501_v13 }
 0x151   : > { %531 = vst.sshfl [vmem:[#allocation1] sm:$0xff pattern:$0x75316420] %v523_v14  ;;  %v482_v18 = vmul.f32 %v1492_v60, %v481_v15 }
 0x152   : > { %543 = vst [vmem:[#allocation1] ss:$2 sm:$0xff] %v523_v14  ;;  %v506_v20 = vsel %vm505_vm11, %v1490_v57, %v502_v17  ;;  %v620_v17 = vld [vmem:[#allocation8 + $0x18] sm:$0xff] }
 0x153   : > { %537 = vst.sshfl [vmem:[#allocation1 + $0x20] sm:$0xff pattern:$0x75316420] %v525_v16  ;;  %v510_v19 = vmul.f32 %v506_v20, %v2018_v29  ;;  %v486_v21 = vsel %vm485_vm13, %v1492_v60, %v482_v18 }
 0x154   : > { %v508_v22 = vmul.f32 %v486_v21, %v2020_v30 }
 0x155   : > { %v518_v23 = vmul.f32 %v1479_v63, %v510_v19 }
 0x156   : > { %v516_v24 = vmul.f32 %v1479_v63, %v508_v22 }
 0x157   : > { %v526_v25 = vadd.f32 %v1480_v4, %v518_v23 }
 0x158   : > { %v533_v26 = vld [vmem:[#allocation1 + $0x1] ss:$2 sm:$0xff]  ;;  %v524_v27 = vadd.f32 %v1480_v4, %v516_v24 }
 0x159   : > { %551 = vst [vmem:[#allocation1 + $0x20] ss:$2 sm:$0xff] %v533_v26 }
 0x15a   : > { %v539_v28 = vld [vmem:[#allocation1 + $0x21] ss:$2 sm:$0xff]  ;;  %540 = vst.sshfl [vmem:[#allocation1 + $0x30] sm:$0xff pattern:$0x75316420] %v526_v25 }
 0x15b   : > { %555 = vst [vmem:[#allocation1 + $0x30] ss:$2 sm:$0xff] %v539_v28 }
 0x15c   : > { %534 = vst.sshfl [vmem:[#allocation1 + $0x10] sm:$0xff pattern:$0x75316420] %v524_v27 }
 0x15d   : > { %545 = vst [vmem:[#allocation1 + $0x1] ss:$2 sm:$0xff] %v524_v27 }
 0x15e   : > { %547 = vst [vmem:[#allocation1 + $0x10] ss:$2 sm:$0xff] %v525_v16 }
 0x161   : > { %v542_v31 = vld [vmem:[#allocation1 + $0x31] ss:$2 sm:$0xff] }
 0x162   : > { %557 = vst [vmem:[#allocation1 + $0x31] ss:$2 sm:$0xff] %v542_v31 }
 0x163   : > { %v536_v32 = vld [vmem:[#allocation1 + $0x11] ss:$2 sm:$0xff] }
 0x164   : > { %549 = vst [vmem:[#allocation1 + $0x11] ss:$2 sm:$0xff] %v526_v25  ;;  %v558_v29 = vld.sshfl [vmem:[#allocation1] sm:$0xff pattern:$0x75316420] }
 0x165   : > { %553 = vst [vmem:[#allocation1 + $0x21] ss:$2 sm:$0xff] %v536_v32 }
 0x169   : > { %v561_v35 = vld.sshfl [vmem:[#allocation1 + $0x30] sm:$0xff pattern:$0x75316420] }
 0x16b   : > { %v559_v33 = vld.sshfl [vmem:[#allocation1 + $0x10] sm:$0xff pattern:$0x75316420] }
 0x16c   : > { %v566_v30 = vpack.c.bf16 %v559_v33, %v558_v29  ;;  %v560_v34 = vld.sshfl [vmem:[#allocation1 + $0x20] sm:$0xff pattern:$0x75316420] }
 0x16d   : > { %v567_v36 = vpack.c.bf16 %v561_v35, %v560_v34 }
 0x16e   : > { %1318 = vmatmul.msk.bf16.vlgmr.msra.gmra.mxu0 %vm415_vm0, %v566_v30 }
 0x17e   : > { %1319 = vmatmul.msk.bf16.gmra.mxu0 %vm415_vm0, %v567_v36 }
 0x1eb   : > { %v603_v37 = vpop.f32.mrf.mxu0 }
 0x1ec   : > { %v604_v39 = vadd.f32 %v1481_v38, %v603_v37 }
 0x1ee   : > { %v613_v41 = vpack.c.bf16 %v604_v39, %v604_v39 }
 0x1f0   : > { %v623_v44 = vunpack.c.l.b16 %v613_v41 }
 0x1f3   : > { %v605_v40 = vpop.f32.mrf.mxu0 }
 0x1f4   : > { %v606_v42 = vadd.f32 %v1481_v38, %v605_v40 }
 0x1f6   : > { %v614_v43 = vpack.c.bf16 %v606_v42, %v606_v42 }
 0x1f8   : > { %v624_v45 = vunpack.c.l.b16 %v614_v43 }
 0x1fa   : > { %v2040_v46 = vpack.c.b16 %v624_v45, %v623_v44 }
 0x1fb   : > { %v608_v47 = vpop.f32.mrf.mxu0 }
 0x1fc   : > { %832 = vrot.lane.b32.xlu1 %v2040_v46, %s1792_s22  ;;  %626 = vrot.lane.b32.xlu2 %v2040_v46, %s1793_s18  ;;  %v609_v48 = vadd.f32 %v1481_v38, %v608_v47 }
 0x1fe   : > { %v615_v50 = vpack.c.bf16 %v609_v48, %v609_v48 }
 0x200   : > { %v651_v53 = vunpack.c.l.b16 %v615_v50 }
 0x203   : > { %v610_v49 = vpop.f32.mrf.mxu0 }
 0x204   : > { %v611_v51 = vadd.f32 %v1481_v38, %v610_v49  ;;  %830 = vrot.lane.b32.xlu2 %v2040_v46, %s1794_s21 }
 0x206   : > { %v616_v52 = vpack.c.bf16 %v611_v51, %v611_v51 }
 0x208   : > { %v652_v54 = vunpack.c.l.b16 %v616_v52 }
 0x20a   : > { %v2045_v55 = vpack.c.b16 %v652_v54, %v651_v53 }
 0x20c   : > { %854 = vrot.lane.b32.xlu2 %v2045_v55, %s1794_s21  ;;  %654 = vrot.lane.b32.xlu0 %v2045_v55, %s1793_s18  ;;  %s1160_s21 = sshll.u32 %s407_s30, 4  ;;  %s1161_s21 = int_to_ptr.vmem [resolvable:$true] %s1160_s21 }
 0x214   : > { %856 = vrot.lane.b32.xlu0 %v2045_v55, %s1792_s22  ;;  %s1159_s22 = scalar_lea.hbm %s2244_s17, %s1341_s26 }
 0x256   : > { %v627_v56 = vpop.permute.xlu2 %626 }
 0x257   : > { %v633_v57 = vsel %vm628_vm14, %v627_v56, 0 }
 0x258   : > { %642 = vmatpush.bf16.xpose.msra.mxu2 %v633_v57 }
 0x25e   : > { %v831_v60 = vpop.permute.xlu2 %830 }
 0x25f   : > { %1320 = vmatmul.msk.bf16.vlgmr.msra.gmra.mxu2 %vm628_vm14, %v2040_v46 }
 0x266   : > { %v855_v1 = vpop.permute.xlu2 %854 }
 0x26e   : > { %v833_v58 = vpop.permute.xlu1 %832 }
 0x26f   : > { %v838_v59 = vsel %vm628_vm14, %v833_v58, 0 }
 0x270   : > { %847 = vmatpush.bf16.xpose.msra.mxu1 %v838_v59 }
 0x277   : > { %1324 = vmatmul.msk.bf16.vlgmr.msra.gmra.mxu1 %vm628_vm14, %v831_v60 }
 0x27e   : > { %v655_v61 = vpop.permute.xlu0 %654 }
 0x27f   : > { %v660_v62 = vsel %vm628_vm14, %v655_v61, 0 }
 0x280   : > { %669 = vmatpush.bf16.xpose.msrb.mxu2 %v660_v62 }
 0x286   : > { %v857_v63 = vpop.permute.xlu0 %856 }
 0x287   : > { %v862_v0 = vsel %vm628_vm14, %v857_v63, 0  ;;  %1321 = vmatmul.msk.bf16.vlgmr.msrb.gmra.mxu2 %vm628_vm14, %v2045_v55 }
 0x288   : > { %871 = vmatpush.bf16.xpose.msra.mxu2 %v862_v0 }
 0x297   : > { %1325 = vmatmul.msk.bf16.vlgmr.msra.gmra.mxu2 %vm628_vm14, %v855_v1 }
 0x2e2   : > { %v644_v3 = vpop.f32.mrf.mxu2 }
 0x2e3   : > { %v645_v4 = vadd.f32 %v644_v3, %v617_v2 }
 0x2e5   : > { %v676_v5 = vsel %vm628_vm14, %v645_v4, -inf }
 0x2e6   : > { %677 = vmax.xlane.f32.xlu1 %v676_v5 }
 0x2ea   : > { %v646_v7 = vpop.f32.mrf.mxu2 }
 0x2eb   : > { %v647_v8 = vadd.f32 %v646_v7, %v618_v6 }
 0x2ed   : > { %v679_v9 = vsel %vm628_vm14, %v647_v8, -inf }
 0x2ee   : > { %680 = vmax.xlane.f32.xlu0 %v679_v9 }
 0x2f4   : > { %v849_v11 = vpop.f32.mrf.mxu1 }
 0x2f5   : > { %v850_v12 = vadd.f32 %v849_v11, %v619_v10 }
 0x2f7   : > { %v878_v13 = vsel %vm628_vm14, %v850_v12, -inf }
 0x2f8   : > { %879 = vmax.xlane.f32.xlu0 %v878_v13 }
 0x2fc   : > { %v851_v18 = vpop.f32.mrf.mxu1 }
 0x2fd   : > { %v852_v20 = vadd.f32 %v851_v18, %v620_v17 }
 0x2ff   : > { %v881_v23 = vsel %vm628_vm14, %v852_v20, -inf }
 0x30a   : > { %v671_v14 = vpop.f32.mrf.mxu2 }
 0x30b   : > { %v672_v15 = vadd.f32 %v671_v14, %v617_v2 }
 0x30d   : > { %v682_v16 = vsel %vm628_vm14, %v672_v15, -inf }
 0x30e   : > { %683 = vmax.xlane.f32.xlu2 %v682_v16 }
 0x312   : > { %v673_v19 = vpop.f32.mrf.mxu2 }
 0x313   : > { %v674_v21 = vadd.f32 %v673_v19, %v618_v6 }
 0x315   : > { %v685_v22 = vsel %vm628_vm14, %v674_v21, -inf }
 0x316   : > { %686 = vmax.xlane.f32.xlu1 %v685_v22  ;;  %882 = vmax.xlane.f32.xlu2 %v881_v23 }
 0x31a   : > { %v873_v24 = vpop.f32.mrf.mxu2 }
 0x31b   : > { %v874_v25 = vadd.f32 %v873_v24, %v619_v10 }
 0x31d   : > { %v884_v26 = vsel %vm628_vm14, %v874_v25, -inf }
 0x31e   : > { %885 = vmax.xlane.f32.xlu2 %v884_v26 }
 0x322   : > { %v875_v27 = vpop.f32.mrf.mxu2 }
 0x323   : > { %v876_v28 = vadd.f32 %v875_v27, %v620_v17 }
 0x325   : > { %v887_v31 = vsel %vm628_vm14, %v876_v28, -inf }
 0x326   : > { %888 = vmax.xlane.f32.xlu1 %v887_v31 }
 0x359   : > { %v678_v32 = vpop.xlane.xlu1 %677 }
 0x35a   : > { %v688_v29 = vsub.f32 %v645_v4, %v678_v32 }
 0x35c   : > { %v692_v33 = vmul.f32 1.442695, %v688_v29 }
 0x35e   : > { %1493 = vpow2.f32 %v692_v33 }
 0x361   : > { %v681_v30 = vpop.xlane.xlu0 %680 }
 0x362   : > { %v689_v38 = vsub.f32 %v647_v8, %v681_v30 }
 0x364   : > { %v2068_v34 = vpop.eup %1493  ;;  %v694_v40 = vmul.f32 1.442695, %v689_v38 }
 0x365   : > { %v700_v35 = vsel %vm628_vm14, %v2068_v34, 0.0 }
 0x366   : > { %701 = vadd.xlane.f32.xlu1 %v700_v35 }
 0x36b   : > { %v880_v36 = vpop.xlane.xlu0 %879 }
 0x36c   : > { %v890_v37 = vsub.f32 %v850_v12, %v880_v36 }
 0x36e   : > { %v894_v39 = vmul.f32 1.442695, %v890_v37 }
 0x370   : > { %1495 = vpow2.f32 %v894_v39 }
 0x371   : > { %1497 = vpow2.f32 %v694_v40 }
 0x376   : > { %v2072_v41 = vpop.eup %1495 }
 0x377   : > { %v902_v42 = vsel %vm628_vm14, %v2072_v41, 0.0  ;;  %v2076_v43 = vpop.eup %1497 }
 0x378   : > { %903 = vadd.xlane.f32.xlu0 %v902_v42  ;;  %v703_v44 = vsel %vm628_vm14, %v2076_v43, 0.0 }
 0x37f   : > { %781 = vrot.lane.b32.xlu1 %v2040_v46, %s1795_s8 }
 0x380   : > { %704 = vadd.xlane.f32.xlu0 %v703_v44 }
 0x381   : > { %v684_v45 = vpop.xlane.xlu2 %683 }
 0x382   : > { %v690_v47 = vsub.f32 %v672_v15, %v684_v45 }
 0x384   : > { %v696_v48 = vmul.f32 1.442695, %v690_v47 }
 0x386   : > { %1499 = vpow2.f32 %v696_v48 }
 0x387   : > { %983 = vrot.lane.b32.xlu1 %v2040_v46, %s1796_s27 }
 0x389   : > { %v687_v49 = vpop.xlane.xlu1 %686  ;;  %v883_v50 = vpop.xlane.xlu2 %882 }
 0x38a   : > { %v691_v51 = vsub.f32 %v674_v21, %v687_v49  ;;  %v891_v54 = vsub.f32 %v852_v20, %v883_v50 }
 0x38c   : > { %v2084_v52 = vpop.eup %1499  ;;  %v698_v53 = vmul.f32 1.442695, %v691_v51  ;;  %v896_v57 = vmul.f32 1.442695, %v891_v54 }
 0x38d   : > { %v706_v56 = vsel %vm628_vm14, %v2084_v52, 0.0 }
 0x38e   : > { %1501 = vpow2.f32 %v698_v53  ;;  %707 = vadd.xlane.f32.xlu0 %v706_v56 }
 0x38f   : > { %1503 = vpow2.f32 %v896_v57 }
 0x391   : > { %v886_v58 = vpop.xlane.xlu2 %885 }
 0x392   : > { %v892_v60 = vsub.f32 %v874_v25, %v886_v58 }
 0x394   : > { %v2088_v59 = vpop.eup %1501  ;;  %v898_v61 = vmul.f32 1.442695, %v892_v60 }
 0x395   : > { %v709_v46 = vsel %vm628_vm14, %v2088_v59, 0.0  ;;  %v2092_v63 = vpop.eup %1503 }
 0x396   : > { %710 = vadd.xlane.f32.xlu2 %v709_v46  ;;  %1505 = vpow2.f32 %v898_v61  ;;  %v905_v1 = vsel %vm628_vm14, %v2092_v63, 0.0 }
 0x399   : > { %v889_v62 = vpop.xlane.xlu1 %888 }
 0x39a   : > { %v893_v0 = vsub.f32 %v876_v28, %v889_v62 }
 0x39c   : > { %v900_v2 = vmul.f32 1.442695, %v893_v0  ;;  %v2096_v3 = vpop.eup %1505 }
 0x39d   : > { %v908_v4 = vsel %vm628_vm14, %v2096_v3, 0.0 }
 0x39e   : > { %906 = vadd.xlane.f32.xlu2 %v905_v1  ;;  %1507 = vpow2.f32 %v900_v2 }
 0x3a2   : > { %806 = vrot.lane.b32.xlu0 %v2045_v55, %s1795_s8 }
 0x3a4   : > { %v2102_v5 = vpop.eup %1507 }
 0x3a5   : > { %v911_v6 = vsel %vm628_vm14, %v2102_v5, 0.0 }
 0x3a6   : > { %909 = vadd.xlane.f32.xlu2 %v908_v4 }
 0x3ae   : > { %912 = vadd.xlane.f32.xlu2 %v911_v6 }
 0x3c6   : > { %1008 = vrot.lane.b32.xlu2 %v2045_v55, %s1796_s27  ;;  %s1162_s27 = sshll.u32 %s1159_s22, 4  ;;  %s1163_s27 = int_to_ptr.hbm [resolvable:$true] %s1162_s27 }
 0x3c7   : > { %s1689_s20 = sshra.s32 %s1163_s27, 4  ;;  %s1690_s20 = int_to_ptr.hbm [resolvable:$true] %s1689_s20 }
 0x3c8   : > { %s1691_s25 = scalar_lea.hbm %s1690_s20, 16  ;;  %p1696_p10 = scmp.lt.s32.totalorder %s1690_s20, %s2244_s17 }
 0x3c9   : > { %p1692_p1 = scmp.ne.s32.totalorder %s1690_s20, %s1691_s25  ;;  %p1697_p11 = scmp.lt.s32.totalorder %s1695_s24, %s1691_s25 }
 0x3cb   : > { %p1693_p4 = pnand %p1692_p1, %p1960_p5  ;;  %p1698_p12 = por %p1697_p11, %p1696_p10 }
 0x3cd   : > { %p1694_p8 = pneg %p1693_p4 }
 0x3cf   : > { %p1699_p13 = pnand %p1698_p12, %p1694_p8 }
 0x3d9   : > { %v702_v7 = vpop.xlane.xlu1 %701 }
 0x3da   : > { %1509 = vrcp.f32 %v702_v7  ;;  %v723_v16 = vand.u32 2147483648, %v702_v7  ;;  %vm717_vm1 = vweird.f32 %v702_v7  ;;  %v721_v17 = vand.u32 2147483647, %v702_v7 }
 0x3dc   : > { %v724_v19 = vor.u32 1.1754944e-38, %v723_v16  ;;  %vm722_vm3 = vcmp.eq.f32.partialorder %v721_v17, 8.507059e+37 }
 0x3e0   : > { %v1510_v8 = vpop.eup %1509 }
 0x3e1   : > { %v713_v9 = vmul.f32 %v1510_v8, %v702_v7  ;;  %vm718_vm15 = vweird.f32 %v1510_v8 }
 0x3e2   : > { %vm719_vm2 = vmor %vm717_vm1, %vm718_vm15 }
 0x3e3   : > { %v714_v11 = vsub.f32 1.0, %v713_v9 }
 0x3e5   : > { %v715_v13 = vmul.f32 %v1510_v8, %v714_v11 }
 0x3e7   : > { %v716_v15 = vadd.f32 %v1510_v8, %v715_v13 }
 0x3e9   : > { %v720_v20 = vsel %vm719_vm2, %v1510_v8, %v716_v15 }
 0x3ea   : > { %v725_v23 = vsel %vm722_vm3, %v724_v19, %v720_v20 }
 0x3eb   : > { %v2108_v10 = vpop.xlane.xlu0 %903  ;;  %v768_v28 = vmul.f32 %v2068_v34, %v725_v23 }
 0x3ec   : > { %v923_v19 = vand.u32 2147483647, %v2108_v10 }
 0x3ed   : > { %v772_v30 = vpack.c.bf16 %v768_v28, %v768_v28 }
 0x3ef   : > { %v778_v39 = vunpack.c.l.b16 %v772_v30 }
 0x3f1   : > { %v782_v12 = vpop.permute.xlu1 %781 }
 0x3f2   : > { %794 = vmatpush.bf16.msra.mxu3 %v782_v12 }
 0x3f3   : > { %v705_v14 = vpop.xlane.xlu0 %704 }
 0x3f4   : > { %1511 = vrcp.f32 %v705_v14  ;;  %v737_v22 = vand.u32 2147483648, %v705_v14  ;;  %v735_v25 = vand.u32 2147483647, %v705_v14  ;;  %vm731_vm5 = vweird.f32 %v705_v14 }
 0x3f6   : > { %v738_v31 = vor.u32 1.1754944e-38, %v737_v22  ;;  %vm736_vm7 = vcmp.eq.f32.partialorder %v735_v25, 8.507059e+37 }
 0x3f9   : > { %v984_v62 = vpop.permute.xlu1 %983 }
 0x3fa   : > { %v1512_v18 = vpop.eup %1511 }
 0x3fb   : > { %v727_v55 = vmul.f32 %v1512_v18, %v705_v14  ;;  %vm732_vm4 = vweird.f32 %v1512_v18 }
 0x3fc   : > { %vm733_vm6 = vmor %vm731_vm5, %vm732_vm4  ;;  %vm919_vm4 = vweird.f32 %v2108_v10 }
 0x3fd   : > { %v728_v21 = vsub.f32 1.0, %v727_v55 }
 0x3ff   : > { %v729_v24 = vmul.f32 %v1512_v18, %v728_v21  ;;  %v925_v21 = vand.u32 2147483648, %v2108_v10 }
 0x401   : > { %v730_v26 = vadd.f32 %v1512_v18, %v729_v24  ;;  %v708_v27 = vpop.xlane.xlu0 %707 }
 0x402   : > { %1513 = vrcp.f32 %v708_v27  ;;  %v751_v47 = vand.u32 2147483648, %v708_v27  ;;  %vm745_vm9 = vweird.f32 %v708_v27  ;;  %v749_v48 = vand.u32 2147483647, %v708_v27 }
 0x403   : > { %v734_v32 = vsel %vm733_vm6, %v1512_v18, %v730_v26  ;;  %1515 = vrcp.f32 %v2108_v10 }
 0x404   : > { %v739_v29 = vsel %vm736_vm7, %v738_v31, %v734_v32  ;;  %v752_v56 = vor.u32 1.1754944e-38, %v751_v47  ;;  %vm750_vm11 = vcmp.eq.f32.partialorder %v749_v48, 8.507059e+37 }
 0x405   : > { %v769_v33 = vmul.f32 %v2076_v43, %v739_v29  ;;  %v926_v29 = vor.u32 1.1754944e-38, %v925_v21 }
 0x407   : > { %v773_v35 = vpack.c.bf16 %v769_v33, %v769_v33 }
 0x408   : > { %v1514_v36 = vpop.eup %1513 }
 0x409   : > { %v741_v37 = vmul.f32 %v1514_v36, %v708_v27  ;;  %v711_v38 = vpop.xlane.xlu2 %710  ;;  %v779_v40 = vunpack.c.l.b16 %v773_v35  ;;  %v2113_v44 = vpop.eup %1515  ;;  %vm746_vm8 = vweird.f32 %v1514_v36 }
 0x40a   : > { %1517 = vrcp.f32 %v711_v38  ;;  %v915_v50 = vmul.f32 %v2113_v44, %v2108_v10  ;;  %vm747_vm10 = vmor %vm745_vm9, %vm746_vm8  ;;  %v765_v46 = vand.u32 2147483648, %v711_v38  ;;  %v763_v1 = vand.u32 2147483647, %v711_v38 }
 0x40b   : > { %v742_v42 = vsub.f32 1.0, %v741_v37  ;;  %v780_v34 = vpack.c.b16 %v779_v40, %v778_v39  ;;  %vm759_vm13 = vweird.f32 %v711_v38  ;;  %vm920_vm2 = vweird.f32 %v2113_v44 }
 0x40c   : > { %v916_v58 = vsub.f32 1.0, %v915_v50  ;;  %v766_v8 = vor.u32 1.1754944e-38, %v765_v46  ;;  %vm764_vm1 = vcmp.eq.f32.partialorder %v763_v1, 8.507059e+37  ;;  %vm2126_vm5 = vmor %vm919_vm4, %vm920_vm2  ;;  %vm924_vm9 = vcmp.eq.f32.partialorder %v923_v19, 8.507059e+37 }
 0x40d   : > { %v743_v45 = vmul.f32 %v1514_v36, %v742_v42  ;;  %1322 = vmatmul.msk.bf16.vlgmr.msra.gmra.mxu3 %vm628_vm14, %v780_v34 }
 0x40e   : > { %v917_v7 = vmul.f32 %v2113_v44, %v916_v58 }
 0x40f   : > { %v744_v43 = vadd.f32 %v1514_v36, %v743_v45 }
 0x410   : > { %v1518_v49 = vpop.eup %1517  ;;  %v918_v17 = vadd.f32 %v2113_v44, %v917_v7 }
 0x411   : > { %v748_v51 = vsel %vm747_vm10, %v1514_v36, %v744_v43  ;;  %v755_v53 = vmul.f32 %v1518_v49, %v711_v38  ;;  %v907_v54 = vpop.xlane.xlu2 %906  ;;  %vm760_vm12 = vweird.f32 %v1518_v49 }
 0x412   : > { %1519 = vrcp.f32 %v907_v54  ;;  %v753_v60 = vsel %vm750_vm11, %v752_v56, %v748_v51  ;;  %vm761_vm15 = vmor %vm759_vm13, %vm760_vm12  ;;  %v937_v55 = vand.u32 2147483647, %v907_v54  ;;  %vm933_vm6 = vweird.f32 %v907_v54 }
 0x413   : > { %v756_v57 = vsub.f32 1.0, %v755_v53  ;;  %v770_v4 = vmul.f32 %v2084_v52, %v753_v60  ;;  %v939_v52 = vand.u32 2147483648, %v907_v54  ;;  %v922_v26 = vsel %vm2126_vm5, %v2113_v44, %v918_v17  ;;  %v1346_v17 = vld [vmem:[#allocation10] sm:$0xff] }
 0x414   : > { %v807_v61 = vpop.permute.xlu0 %806  ;;  %vm938_vm8 = vcmp.eq.f32.partialorder %v937_v55, 8.507059e+37  ;;  %v927_v35 = vsel %vm924_vm9, %v926_v29, %v922_v26 }
 0x415   : > { %v757_v0 = vmul.f32 %v1518_v49, %v756_v57  ;;  %819 = vmatpush.bf16.msrb.mxu3 %v807_v61  ;;  %v774_v16 = vpack.c.bf16 %v770_v4, %v770_v4  ;;  %v940_v27 = vor.u32 1.1754944e-38, %v939_v52  ;;  %v970_v39 = vmul.f32 %v2072_v41, %v927_v35 }
 0x417   : > { %v758_v2 = vadd.f32 %v1518_v49, %v757_v0  ;;  %v803_v23 = vunpack.c.l.b16 %v774_v16  ;;  %v1347_v16 = vld [vmem:[#allocation10 + $0x8] sm:$0xff] }
 0x418   : > { %v1520_v6 = vpop.eup %1519  ;;  %1092 = vmatpush.bf16.msrb.mxu1 %v1347_v16 }
 0x419   : > { %996 = vmatpush.bf16.msra.mxu3 %v984_v62  ;;  %v762_v9 = vsel %vm761_vm15, %v1518_v49, %v758_v2  ;;  %v929_v11 = vmul.f32 %v1520_v6, %v907_v54  ;;  %v910_v12 = vpop.xlane.xlu2 %909  ;;  %vm934_vm3 = vweird.f32 %v1520_v6  ;;  %v974_v49 = vpack.c.bf16 %v970_v39, %v970_v39 }
 0x41a   : > { %v767_v13 = vsel %vm764_vm1, %v766_v8, %v762_v9  ;;  %1521 = vrcp.f32 %v910_v12  ;;  %vm935_vm7 = vmor %vm933_vm6, %vm934_vm3  ;;  %v953_v38 = vand.u32 2147483648, %v910_v12  ;;  %vm947_vm11 = vweird.f32 %v910_v12 }
 0x41b   : > { %v930_v14 = vsub.f32 1.0, %v929_v11  ;;  %v771_v15 = vmul.f32 %v2088_v59, %v767_v13  ;;  %v951_v42 = vand.u32 2147483647, %v910_v12  ;;  %v980_v56 = vunpack.c.l.b16 %v974_v49 }
 0x41c   : > { %v954_v48 = vor.u32 1.1754944e-38, %v953_v38  ;;  %1093 = vmatpush.bf16.msrb.mxu1 %v1346_v17  ;;  %v1482_v38 = vld [vmem:[%s2205_s7] ss:$0 sm:$0xff] }
 0x41d   : > { %v931_v18 = vmul.f32 %v1520_v6, %v930_v14  ;;  %v775_v20 = vpack.c.bf16 %v771_v15, %v771_v15  ;;  %vm952_vm13 = vcmp.eq.f32.partialorder %v951_v42, 8.507059e+37 }
 0x41f   : > { %v932_v59 = vadd.f32 %v1520_v6, %v931_v18  ;;  %v804_v24 = vunpack.c.l.b16 %v775_v20 }
 0x420   : > { %v1522_v25 = vpop.eup %1521 }
 0x421   : > { %v936_v28 = vsel %vm935_vm7, %v1520_v6, %v932_v59  ;;  %v943_v31 = vmul.f32 %v1522_v25, %v910_v12  ;;  %v913_v32 = vpop.xlane.xlu2 %912  ;;  %v805_v10 = vpack.c.b16 %v804_v24, %v803_v23  ;;  %vm948_vm10 = vweird.f32 %v1522_v25 }
 0x422   : > { %v941_v33 = vsel %vm938_vm8, %v940_v27, %v936_v28  ;;  %1523 = vrcp.f32 %v913_v32  ;;  %vm949_vm12 = vmor %vm947_vm11, %vm948_vm10  ;;  %v967_v51 = vand.u32 2147483648, %v913_v32  ;;  %v965_v41 = vand.u32 2147483647, %v913_v32 }
 0x423   : > { %v944_v30 = vsub.f32 1.0, %v943_v31  ;;  %1323 = vmatmul.msk.bf16.vlgmr.msrb.gmra.mxu3 %vm628_vm14, %v805_v10  ;;  %v971_v36 = vmul.f32 %v2092_v63, %v941_v33  ;;  %vm961_vm1 = vweird.f32 %v913_v32 }
 0x424   : > { %v968_v60 = vor.u32 1.1754944e-38, %v967_v51  ;;  %vm966_vm3 = vcmp.eq.f32.partialorder %v965_v41, 8.507059e+37 }
 0x425   : > { %v945_v37 = vmul.f32 %v1522_v25, %v944_v30  ;;  %v975_v44 = vpack.c.bf16 %v971_v36, %v971_v36 }
 0x427   : > { %v946_v40 = vadd.f32 %v1522_v25, %v945_v37  ;;  %v981_v53 = vunpack.c.l.b16 %v975_v44 }
 0x428   : > { %v1524_v34 = vpop.eup %1523 }
 0x429   : > { %v950_v45 = vsel %vm949_vm12, %v1522_v25, %v946_v40  ;;  %v957_v47 = vmul.f32 %v1524_v34, %v913_v32  ;;  %v1009_v43 = vpop.permute.xlu2 %1008  ;;  %vm962_vm15 = vweird.f32 %v1524_v34  ;;  %v982_v61 = vpack.c.b16 %v981_v53, %v980_v56 }
 0x42a   : > { %1021 = vmatpush.bf16.msrb.mxu0 %v1009_v43  ;;  %v955_v63 = vsel %vm952_vm13, %v954_v48, %v950_v45  ;;  %vm963_vm2 = vmor %vm961_vm1, %vm962_vm15 }
 0x42b   : > { %v958_v50 = vsub.f32 1.0, %v957_v47  ;;  %v972_v58 = vmul.f32 %v2096_v3, %v955_v63 }
 0x42d   : > { %v959_v54 = vmul.f32 %v1524_v34, %v958_v50  ;;  %v976_v1 = vpack.c.bf16 %v972_v58, %v972_v58 }
 0x42f   : > { %v960_v57 = vadd.f32 %v1524_v34, %v959_v54  ;;  %v1005_v4 = vunpack.c.l.b16 %v976_v1 }
 0x431   : > { %v964_v46 = vsel %vm963_vm2, %v1524_v34, %v960_v57 }
 0x432   : > { %v969_v62 = vsel %vm966_vm3, %v968_v60, %v964_v46 }
 0x433   : > { %1326 = vmatmul.msk.bf16.vlgmr.msra.gmra.mxu3 %vm628_vm14, %v982_v61  ;;  %v973_v0 = vmul.f32 %v2102_v5, %v969_v62 }
 0x435   : > { %v977_v2 = vpack.c.bf16 %v973_v0, %v973_v0 }
 0x437   : > { %v1006_v6 = vunpack.c.l.b16 %v977_v2 }
 0x439   : > { %v1007_v7 = vpack.c.b16 %v1006_v6, %v1005_v4 }
 0x43b   : > { %1327 = vmatmul.msk.bf16.vlgmr.msrb.gmra.mxu0 %vm628_vm14, %v1007_v7 }
 0x490   : > { %v796_v8 = vpop.f32.mrf.mxu3 }
 0x491   : > { %v826_v9 = vpack.c.bf16 %v796_v8, %v796_v8 }
 0x493   : > { %v1036_v12 = vunpack.c.l.b16 %v826_v9 }
 0x498   : > { %v798_v3 = vpop.f32.mrf.mxu3 }
 0x499   : > { %v827_v11 = vpack.c.bf16 %v798_v3, %v798_v3 }
 0x49b   : > { %v1037_v13 = vunpack.c.l.b16 %v827_v11 }
 0x49d   : > { %v1040_v14 = vpack.c.b16 %v1037_v13, %v1036_v12 }
 0x4a6   : > { %v821_v15 = vpop.f32.mrf.mxu3 }
 0x4a7   : > { %v828_v52 = vpack.c.bf16 %v821_v15, %v821_v15 }
 0x4a9   : > { %v1038_v55 = vunpack.c.l.b16 %v828_v52 }
 0x4ae   : > { %v823_v5 = vpop.f32.mrf.mxu3 }
 0x4af   : > { %v829_v18 = vpack.c.bf16 %v823_v5, %v823_v5 }
 0x4b1   : > { %v1039_v20 = vunpack.c.l.b16 %v829_v18 }
 0x4b3   : > { %v1041_v19 = vpack.c.b16 %v1039_v20, %v1038_v55 }
 0x4b6   : > { %v998_v21 = vpop.f32.mrf.mxu3 }
 0x4b7   : > { %v1028_v59 = vpack.c.bf16 %v998_v21, %v998_v21 }
 0x4b8   : > { %v1023_v22 = vpop.f32.mrf.mxu0 }
 0x4b9   : > { %v1030_v24 = vpack.c.bf16 %v1023_v22, %v1023_v22  ;;  %v1046_v27 = vunpack.c.l.b16 %v1028_v59 }
 0x4bb   : > { %v1048_v32 = vunpack.c.l.b16 %v1030_v24 }
 0x4be   : > { %v1000_v23 = vpop.f32.mrf.mxu3 }
 0x4bf   : > { %v1029_v25 = vpack.c.bf16 %v1000_v23, %v1000_v23 }
 0x4c0   : > { %v1025_v26 = vpop.f32.mrf.mxu0 }
 0x4c1   : > { %v1047_v28 = vunpack.c.l.b16 %v1029_v25  ;;  %v1031_v31 = vpack.c.bf16 %v1025_v26, %v1025_v26 }
 0x4c3   : > { %v1050_v10 = vpack.c.b16 %v1047_v28, %v1046_v27  ;;  %v1049_v29 = vunpack.c.l.b16 %v1031_v31 }
 0x4c5   : > { %v1051_v33 = vpack.c.b16 %v1049_v29, %v1048_v32  ;;  %1052 = vrot.lane.b32.xlu0 %v1050_v10, %s1797_s14 }
 0x4c7   : > { %1054 = vrot.lane.b32.xlu1 %v1051_v33, %s1797_s14  ;;  %s1146_s14 = scalar_lea.sflag [#allocation4], %s1988_s1 }
 0x537   : > { %v1053_v30 = vpop.permute.xlu0 %1052 }
 0x538   : > { %v1058_v35 = vsel %vm628_vm14, %v1040_v14, %v1053_v30 }
 0x539   : > { %1336 = vmatmul.msk.bf16.vlgmr.msrb.gmra.mxu1 %vm415_vm0, %v1058_v35  ;;  %v1055_v36 = vpop.permute.xlu1 %1054 }
 0x53a   : > { %v1061_v37 = vsel %vm628_vm14, %v1041_v19, %v1055_v36 }
 0x549   : > { %1337 = vmatmul.msk.bf16.gmra.mxu1 %vm415_vm0, %v1061_v37  ;;  %vm1140_vm0 = vcmask 257024  }
 0x5b6   : > { %v1095_v39 = vpop.f32.mrf.mxu1 }
 0x5b7   : > { %v1096_v40 = vadd.f32 %v1482_v38, %v1095_v39 }
 0x5b9   : > { %v1107_v42 = vrot.slane %v1096_v40, 4  ;;  %1113 = vst [vmem:[#allocation1] ss:$2 sm:$0xff] %v1096_v40 }
 0x5bb   : > { %1118 = vst [vmem:[#allocation1 + $0x10] ss:$2 sm:$0xff] %v1107_v42 }
 0x5be   : > { %v1097_v34 = vpop.f32.mrf.mxu1 }
 0x5bf   : > { %v1098_v44 = vadd.f32 %v1482_v38, %v1097_v34 }
 0x5c1   : > { %v1108_v45 = vrot.slane %v1098_v44, 4  ;;  %1123 = vst [vmem:[#allocation1 + $0x20] ss:$2 sm:$0xff] %v1098_v44 }
 0x5c3   : > { %1128 = vst [vmem:[#allocation1 + $0x30] ss:$2 sm:$0xff] %v1108_v45 }
 0x5c6   : > { %v1100_v47 = vpop.f32.mrf.mxu1 }
 0x5c7   : > { %v1101_v43 = vadd.f32 %v1482_v38, %v1100_v47 }
 0x5c9   : > { %v1111_v48 = vrot.slane %v1101_v43, 4  ;;  %1115 = vst [vmem:[#allocation1 + $0x1] ss:$2 sm:$0xff] %v1101_v43 }
 0x5cb   : > { %1120 = vst [vmem:[#allocation1 + $0x11] ss:$2 sm:$0xff] %v1111_v48 }
 0x5ce   : > { %v1102_v49 = vpop.f32.mrf.mxu1 }
 0x5cf   : > { %v1103_v50 = vadd.f32 %v1482_v38, %v1102_v49 }
 0x5d0   : > { %v1116_v63 = vld.sshfl [vmem:[#allocation1] sm:$0xff pattern:$0x75316420] }
 0x5d1   : > { %v1112_v51 = vrot.slane %v1103_v50, 4  ;;  %1125 = vst [vmem:[#allocation1 + $0x21] ss:$2 sm:$0xff] %v1103_v50  ;;  %v1136_v53 = vpack.c.bf16 %v1116_v63, %v1116_v63 }
 0x5d2   : > { %v1121_v54 = vld.sshfl [vmem:[#allocation1 + $0x10] sm:$0xff pattern:$0x75316420] }
 0x5d3   : > { %1130 = vst [vmem:[#allocation1 + $0x31] ss:$2 sm:$0xff] %v1112_v51  ;;  %v1137_v41 = vpack.c.bf16 %v1121_v54, %v1121_v54 }
 0x5d4   : > { %1141 = vst.msk [vmem:[%s407_s30] sm:$0xf] %vm1140_vm0, %v1136_v53 }
 0x5d5   : > { %1142 = vst.msk [vmem:[%s407_s30 + $0x4] sm:$0xf] %vm1140_vm0, %v1137_v41 }
 0x5d8   : > { %v1126_v56 = vld.sshfl [vmem:[#allocation1 + $0x20] sm:$0xff pattern:$0x75316420] }
 0x5d9   : > { %v1138_v57 = vpack.c.bf16 %v1126_v56, %v1126_v56 }
 0x5da   : > { %v1131_v58 = vld.sshfl [vmem:[#allocation1 + $0x30] sm:$0xff pattern:$0x75316420] }
 0x5db   : > { %v1139_v60 = vpack.c.bf16 %v1131_v58, %v1131_v58  ;;  %1143 = vst.msk [vmem:[%s407_s30 + $0x8] sm:$0xf] %vm1140_vm0, %v1138_v57 }
 0x5dd   : > { %1144 = vst.msk [vmem:[%s407_s30 + $0xc] sm:$0xf] %vm1140_vm0, %v1139_v60 }
 0x5de   : > { %1702 = shalt.err (!%p1699_p13)
}
 0x5df   : > { %s1798_s1 = smov 4  }
 0x5e0   : > { %1366 = dma.vmem_to_hbm [thread:$0]  (%p1960_p5), %s1161_s21, 256, %s1163_s27, %s1146_s14, %s1795_s8, %s1795_s8, %s1798_s1  }
 0x5e1 PF: > { %s2246_s23 = sld [smem:[#allocation16_spill]]  ;;  %p1398_p0 = scmp.ge.s32.totalorder %s1781_s12, 2 }
 0x5e3   : > { %p1386_p3 = pnand %p1398_p0, %p1903_p6 }
 0x5e5   : > { %p1387_p7 = pneg %p1386_p3 }
 0x5e7   : > { %s1177_s30 = sand.u32 1, %s2246_s23  }
 0x5e8   : > { %s1178_s9 = scalar_lea.sflag [#allocation4], %s1177_s30 }
 0x5e9   : > { %1748 = dma.done.wait (%p1387_p7), %s1178_s9, 256  }
 0x5ea   : > { %1750 = vsyncadd (%p1387_p7), %s1178_s9, 4294967040  ;;  %s26_s12 = sadd.s32 1, %s1781_s12   ;;  %s2248_s8 = sld [smem:[#allocation20_spill]] }
 0x5eb   : > { %p23_p9 = scmp.ge.s32.totalorder %s26_s12, 6   ;;  %s2249_s27 = smov %s1757_s28 }
 0x5ec   : > { %s2250_s28 = smov %s1761_s29  ;;  %s2251_s29 = smov %s1973_s3 }
 0x5ed   : > { %s2252_s30 = smov %s1773_s10  ;;  %s2253_s9 = smov %s1777_s11 }
 0x5ee   : > { %s2255_s11 = smov %s2261_s19  ;;  %25 = sbr.rel (!%p23_p9) target bundleno = 15 (0xf), region = 131 }
 0x5f0   : > { %s2254_s10 = smov %s2248_s8 }
 0x5f3   :  { %1184 = vsyncpa [#allocation3], 1 }
 0x5f4   :  { %1186 = vsyncpa [#allocation3 + $0x1], 1 }
 0x5f5   :  { %1187 = vsyncpa [#allocation6], 1 }
 0x5f6   :  { %1188 = vsyncpa [#allocation9], 1 }
 0x5f7   :  { %1189 = vsyncpa [#allocation4], 1 }
 0x5f8   :  { %1191 = vsyncpa [#allocation4 + $0x1], 1 }

</bundles_post_ra>
